<compile_context>
chip_gen: v7x
topology: tpu7x:2x2x1
jax: 0.10.0
libtpu: 0.0.40
codegen_flags: <defaults>
</compile_context>

<pallas_src>
import functools

import jax
import jax.numpy as jnp
from jax.experimental import pallas as pl
from jax.experimental.pallas import tpu as pltpu


# ----------------------------------------------------------------------------
# Pallas kernel: attention + feature construction + MLP head (one batch tile)
# ----------------------------------------------------------------------------
def din_kernel(
    uid_ref,      # (TB, E)    f32
    mid_ref,      # (TB, E)    f32
    cat_ref,      # (TB, E)    f32
    hm_ref,       # (TB, T, E) bf16  mid-history embeddings
    hc_ref,       # (TB, T, E) bf16  cat-history embeddings
    mask_ref,     # (TB, T)    f32
    aw1_ref,      # (6, E, A1) bf16  folded attention layer-1 weights
    aw2_ref,      # (A1, A2)   bf16
    w1_ref,       # (9E, H1)   f32   (input BatchNorm folded in)
    w2_ref,       # (H1, H2)   f32
    pack_ref,     # (16, 256)  f32   packed biases / Dice scale-shift / w3 diff
    out_ref,      # (TB, 2)    f32
):
    f32, bf16 = jnp.float32, jnp.bfloat16

    TB, T, E = hm_ref.shape
    A1, A2 = aw2_ref.shape
    H1 = w1_ref.shape[1]
    H2 = w2_ref.shape[1]

    uid = uid_ref[...]
    mid = mid_ref[...]
    cat = cat_ref[...]
    his_m = hm_ref[...]
    his_c = hc_ref[...]
    mask = mask_ref[...]

    # -- packed small parameters (static, zero-cost slices) --
    ab1 = pack_ref[0:1, :A1]
    ab2 = pack_ref[1:2, :A2]
    aw3r = pack_ref[2:3, :A2]
    ab3 = pack_ref[3:4, 0:1]
    b1f = pack_ref[4:5, :H1]
    d1s = pack_ref[5:6, :H1]
    d1t = pack_ref[6:7, :H1]
    d1a = pack_ref[7:8, :H1]
    b2 = pack_ref[8:9, :H2]
    d2s = pack_ref[9:10, :H2]
    d2t = pack_ref[10:11, :H2]
    d2a = pack_ref[11:12, :H2]
    w3d = pack_ref[12:13, :H2]

    mid_b = mid.astype(bf16)
    cat_b = cat.astype(bf16)

    # ---------------- DIN attention (concat folded into weights) ----------------
    # rows of aw1_ref: [Aq_mid, Aq_cat, Ah_mid, Ah_cat, Ap_mid, Ap_cat]
    q_proj = (jnp.dot(mid_b, aw1_ref[0], preferred_element_type=f32) +
              jnp.dot(cat_b, aw1_ref[1], preferred_element_type=f32))      # (TB, A1)

    hm2 = his_m.reshape(TB * T, E)
    hc2 = his_c.reshape(TB * T, E)
    pm2 = (his_m * mid_b[:, None, :]).reshape(TB * T, E)                   # q*his, mid half
    pc2 = (his_c * cat_b[:, None, :]).reshape(TB * T, E)                   # q*his, cat half

    h = (jnp.dot(hm2, aw1_ref[2], preferred_element_type=f32) +
         jnp.dot(hc2, aw1_ref[3], preferred_element_type=f32) +
         jnp.dot(pm2, aw1_ref[4], preferred_element_type=f32) +
         jnp.dot(pc2, aw1_ref[5], preferred_element_type=f32))             # (TB*T, A1)
    h = h.reshape(TB, T, A1) + q_proj[:, None, :] + ab1
    h = jax.nn.sigmoid(h).reshape(TB * T, A1)

    h = jnp.dot(h.astype(bf16), aw2_ref[...], preferred_element_type=f32) + ab2
    h = jax.nn.sigmoid(h)                                                  # (TB*T, A2)

    # N=1 output layer as VPU multiply + lane reduce (avoid a 1-wide matmul).
    s = jnp.sum(h * aw3r, axis=-1, keepdims=True) + ab3                    # (TB*T, 1)
    scores = s.reshape(TB, T)

    neg = jnp.float32(-(2.0 ** 32) + 1.0)
    scores = jnp.where(mask > 0, scores, neg)
    scores = jax.nn.softmax(scores, axis=-1)                               # (TB, T)

    # attention-weighted sum + plain history sum in one batched MXU matmul per half
    coef = jnp.concatenate(
        [scores[:, None, :], jnp.ones_like(scores)[:, None, :]], axis=1
    ).astype(bf16)                                                         # (TB, 2, T)
    red_m = jnp.einsum("bst,bte->bse", coef, his_m, preferred_element_type=f32)
    red_c = jnp.einsum("bst,bte->bse", coef, his_c, preferred_element_type=f32)
    att_m, sum_m = red_m[:, 0, :], red_m[:, 1, :]
    att_c, sum_c = red_c[:, 0, :], red_c[:, 1, :]

    # ---------------- feature construction ----------------
    # [uid, item, his_sum, item*his_sum, att_fea] with item/his split in halves.
    inp = jnp.concatenate(
        [uid, mid, cat, sum_m, sum_c, mid * sum_m, cat * sum_c, att_m, att_c],
        axis=-1)                                                           # (TB, 9E)

    # ---------------- MLP head (BN0 folded into w1/b1; Dice BN folded) ----------
    h1 = jnp.dot(inp, w1_ref[...], preferred_element_type=f32) + b1f       # (TB, H1)
    p = jax.nn.sigmoid(h1 * d1s + d1t)
    h1 = h1 * (p + (1.0 - p) * d1a)                                        # Dice

    h2 = jnp.dot(h1, w2_ref[...], preferred_element_type=f32) + b2         # (TB, H2)
    p = jax.nn.sigmoid(h2 * d2s + d2t)
    h2 = h2 * (p + (1.0 - p) * d2a)                                        # Dice

    # final (H2 -> 2) + softmax == sigmoid of the logit difference
    diff = jnp.sum(h2 * w3d, axis=-1, keepdims=True)                       # (TB, 1)
    p1 = jax.nn.sigmoid(diff)
    out_ref[...] = jnp.concatenate([1.0 - p1, p1], axis=-1)


# ----------------------------------------------------------------------------
# Parameter construction (deterministic, synthetic)
# ----------------------------------------------------------------------------
def init_params(key, n_uid, n_mid, n_cat, emb_dim, hid=(162, 200, 80, 2)):
    ks = jax.random.split(key, 10)
    d2 = 2 * emb_dim
    row = lambda v: jnp.asarray(v, jnp.float32).reshape(1, -1)

    def bn_stats(n):
        # gamma, beta, running_mean, running_var (inference-mode init values)
        return row(jnp.ones(n)), row(jnp.zeros(n)), row(jnp.zeros(n)), row(jnp.ones(n))

    p = {
        "uid_emb": jax.random.normal(ks[0], (n_uid, emb_dim), jnp.float32) * 0.1,
        "mid_emb": jax.random.normal(ks[1], (n_mid, emb_dim), jnp.float32) * 0.1,
        "cat_emb": jax.random.normal(ks[2], (n_cat, emb_dim), jnp.float32) * 0.1,
        # DIN attention MLP: 8E -> 80 -> 40 -> 1 (sigmoid, sigmoid, linear)
        "aw1": jax.random.normal(ks[3], (4 * d2, 80), jnp.float32) * 0.05,
        "ab1": row(jnp.zeros(80)),
        "aw2": jax.random.normal(ks[4], (80, 40), jnp.float32) * 0.05,
        "ab2": row(jnp.zeros(40)),
        "aw3": jax.random.normal(ks[5], (40, 1), jnp.float32) * 0.05,
        "ab3": row(jnp.zeros(1)),
        # head MLP: 162 -> 200 -> 80 -> 2 (Dice, Dice, none; last layer bias-free)
        "w1": jax.random.normal(ks[6], (hid[0], hid[1]), jnp.float32) * 0.05,
        "b1": row(jnp.zeros(hid[1])),
        "w2": jax.random.normal(ks[7], (hid[1], hid[2]), jnp.float32) * 0.05,
        "b2": row(jnp.zeros(hid[2])),
        "w3": jax.random.normal(ks[8], (hid[2], hid[3]), jnp.float32) * 0.05,
        # Dice alphas
        "d1a": row(jnp.full(hid[1], 0.25)),
        "d2a": row(jnp.full(hid[2], 0.25)),
    }
    p["g0"], p["be0"], p["m0"], p["v0"] = bn_stats(hid[0])
    p["d1g"], p["d1b"], p["d1m"], p["d1v"] = bn_stats(hid[1])
    p["d2g"], p["d2b"], p["d2m"], p["d2v"] = bn_stats(hid[2])
    return p


# ----------------------------------------------------------------------------
# Forward wrapper: embedding gathers + weight folding + pallas_call
# ----------------------------------------------------------------------------
@functools.partial(jax.jit, static_argnames=("block_b",))
def din_forward(params, uids, mids, cats, mid_his, cat_his, mid_mask,
                noclk_mids=None, noclk_cats=None, *, block_b=128):
    # TODO(synk): use_negsampling branch only computes values never used in the
    # returned y_hat, so it is omitted (use_negsampling=False semantics).
    # TODO(synk): the history-embedding gather could move in-kernel via
    # PrefetchScalarGridSpec / manual DMA to save one HBM round trip at large T.
    f32, bf16 = jnp.float32, jnp.bfloat16
    E = params["uid_emb"].shape[1]
    D2 = 2 * E

    # ---- embedding gathers (plain JAX; bf16 convert fuses with the gather) ----
    uid_eb = jnp.take(params["uid_emb"], uids, axis=0)                 # (B, E) f32
    mid_eb = jnp.take(params["mid_emb"], mids, axis=0)                 # (B, E) f32
    cat_eb = jnp.take(params["cat_emb"], cats, axis=0)                 # (B, E) f32
    mid_his_eb = jnp.take(params["mid_emb"], mid_his, axis=0).astype(bf16)  # (B,T,E)
    cat_his_eb = jnp.take(params["cat_emb"], cat_his, axis=0).astype(bf16)  # (B,T,E)
    mask = mid_mask.astype(f32)

    # ---- fold attention concat [q, his, q-his, q*his] into the layer-1 weights ----
    aw1 = params["aw1"]                                                # (4*D2, A1)
    A_q, A_h, A_d, A_p = aw1[0:D2], aw1[D2:2 * D2], aw1[2 * D2:3 * D2], aw1[3 * D2:4 * D2]
    aq = A_q + A_d          # multiplies q
    ah = A_h - A_d          # multiplies his
    aw1s = jnp.stack(
        [aq[:E], aq[E:], ah[:E], ah[E:], A_p[:E], A_p[E:]], axis=0).astype(bf16)
    aw2 = params["aw2"].astype(bf16)

    # ---- fold input BatchNorm into FC1, and Dice BNs into scale/shift ----
    scale0 = params["g0"] * jax.lax.rsqrt(params["v0"] + 1e-5)
    shift0 = params["be0"] - params["m0"] * scale0
    w1f = params["w1"] * scale0.reshape(-1, 1)                         # (162, 200)
    b1f = params["b1"] + shift0 @ params["w1"]                         # (1, 200)
    d1s = params["d1g"] * jax.lax.rsqrt(params["d1v"] + 1e-8)
    d1t = params["d1b"] - params["d1m"] * d1s
    d2s = params["d2g"] * jax.lax.rsqrt(params["d2v"] + 1e-8)
    d2t = params["d2b"] - params["d2m"] * d2s
    w3d = (params["w3"][:, 1] - params["w3"][:, 0]).reshape(1, -1)     # (1, 80)
    aw3r = params["aw3"].reshape(1, -1)                                # (1, 40)

    # ---- pack all tiny row parameters into one array (fewer DMA descriptors) ----
    rows = [params["ab1"], params["ab2"], aw3r, params["ab3"], b1f,
            d1s, d1t, params["d1a"], params["b2"], d2s, d2t, params["d2a"], w3d]
    pack_w = ((max(r.shape[-1] for r in rows) + 127) // 128) * 128
    pack = jnp.zeros((16, pack_w), f32)
    for r, v in enumerate(rows):
        v = v.reshape(-1).astype(f32)
        pack = pack.at[r, : v.shape[0]].set(v)

    B = uids.shape[0]
    T = mid_his.shape[1]

    # ---- batch tiling (grid over batch, weights resident) ----
    TB = min(block_b, B)
    if TB < B:
        TB = max(8, (TB // 8) * 8)        # (8,128) rule on the 2nd-minor block dim
    Bp = ((B + TB - 1) // TB) * TB
    grid = (Bp // TB,)

    def padb(x):
        if Bp == B:
            return x
        return jnp.pad(x, [(0, Bp - B)] + [(0, 0)] * (x.ndim - 1))

    uid_eb, mid_eb, cat_eb = padb(uid_eb), padb(mid_eb), padb(cat_eb)
    mid_his_eb, cat_his_eb, mask = padb(mid_his_eb), padb(cat_his_eb), padb(mask)

    batch2 = lambda i: (i, 0)
    batch3 = lambda i: (i, 0, 0)
    const2 = lambda i: (0, 0)
    const3 = lambda i: (0, 0, 0)

    y = pl.pallas_call(
        din_kernel,
        out_shape=jax.ShapeDtypeStruct((Bp, 2), f32),
        grid=grid,
        in_specs=[
            pl.BlockSpec((TB, E), batch2),          # uid
            pl.BlockSpec((TB, E), batch2),          # mid
            pl.BlockSpec((TB, E), batch2),          # cat
            pl.BlockSpec((TB, T, E), batch3),       # mid history (bf16)
            pl.BlockSpec((TB, T, E), batch3),       # cat history (bf16)
            pl.BlockSpec((TB, T), batch2),          # mask
            pl.BlockSpec(aw1s.shape, const3),       # folded attention w1 (resident)
            pl.BlockSpec(aw2.shape, const2),        # attention w2 (resident)
            pl.BlockSpec(w1f.shape, const2),        # head w1 (BN folded, resident)
            pl.BlockSpec(params["w2"].shape, const2),  # head w2 (resident)
            pl.BlockSpec(pack.shape, const2),       # packed small params (resident)
        ],
        out_specs=pl.BlockSpec((TB, 2), batch2),
        compiler_params=pltpu.CompilerParams(
            dimension_semantics=("parallel",),
            vmem_limit_bytes=48 * 1024 * 1024,
        ),
    )(uid_eb, mid_eb, cat_eb, mid_his_eb, cat_his_eb, mask,
      aw1s, aw2, w1f, params["w2"], pack)

    return y[:B] if Bp != B else y


# ----------------------------------------------------------------------------
if __name__ == "__main__":
    # Small, DIN-consistent shapes. HIDDEN_DIM[0] = 162 = 9 * EMBEDDING_DIM -> E = 18.
    n_uid, n_mid, n_cat = 50, 100, 30
    EMB = 18
    B, T = 12, 8

    key = jax.random.PRNGKey(0)
    pkey, dkey = jax.random.split(key)
    params = init_params(pkey, n_uid, n_mid, n_cat, EMB)

    k1, k2, k3, k4, k5, k6 = jax.random.split(dkey, 6)
    uids = jax.random.randint(k1, (B,), 0, n_uid)
    mids = jax.random.randint(k2, (B,), 0, n_mid)
    cats = jax.random.randint(k3, (B,), 0, n_cat)
    mid_his = jax.random.randint(k4, (B, T), 0, n_mid)
    cat_his = jax.random.randint(k5, (B, T), 0, n_cat)
    lengths = jax.random.randint(k6, (B, 1), 1, T + 1)
    mid_mask = (jnp.arange(T)[None, :] < lengths).astype(jnp.float32)

    # block_b=8 -> 2 grid steps + a padded tail: exercises the pipelined grid path.
    y = din_forward(params, uids, mids, cats, mid_his, cat_his, mid_mask, block_b=8)
    y = jax.block_until_ready(y)

    assert y.shape == (B, 2)
    assert bool(jnp.all(jnp.isfinite(y)))
    assert bool(jnp.allclose(jnp.sum(y, axis=-1), 1.0, atol=1e-5))
    print("KERNEL_OK")
</pallas_src>

<mosaic_0001>
module attributes {stable_mosaic.version = 11 : i64} {
  func.func @din_kernel(%arg0: i32, %arg1: memref<8x18xf32, #tpu.memory_space<vmem>>, %arg2: memref<8x18xf32, #tpu.memory_space<vmem>>, %arg3: memref<8x18xf32, #tpu.memory_space<vmem>>, %arg4: memref<8x8x18xbf16, #tpu.memory_space<vmem>>, %arg5: memref<8x8x18xbf16, #tpu.memory_space<vmem>>, %arg6: memref<8x8xf32, #tpu.memory_space<vmem>>, %arg7: memref<6x18x80xbf16, #tpu.memory_space<vmem>>, %arg8: memref<80x40xbf16, #tpu.memory_space<vmem>>, %arg9: memref<162x200xf32, #tpu.memory_space<vmem>>, %arg10: memref<200x80xf32, #tpu.memory_space<vmem>>, %arg11: memref<16x256xf32, #tpu.memory_space<vmem>>, %arg12: memref<8x2xf32, #tpu.memory_space<vmem>>) attributes {dimension_semantics = [#tpu.dimension_semantics<parallel>], iteration_bounds = array<i64: 2>, scalar_prefetch = 0 : i64, scratch_operands = 0 : i64, tpu.core_type = #tpu.core_type<tc>, window_params = [{transform_indices = @transform_0, window_bounds = array<i64: 8, 18>}, {transform_indices = @transform_1, window_bounds = array<i64: 8, 18>}, {transform_indices = @transform_2, window_bounds = array<i64: 8, 18>}, {transform_indices = @transform_3, window_bounds = array<i64: 8, 8, 18>}, {transform_indices = @transform_4, window_bounds = array<i64: 8, 8, 18>}, {transform_indices = @transform_5, window_bounds = array<i64: 8, 8>}, {pipeline_mode = #tpu.pipeline_mode<synchronous>, transform_indices = @transform_6, window_bounds = array<i64: 6, 18, 80>}, {pipeline_mode = #tpu.pipeline_mode<synchronous>, transform_indices = @transform_7, window_bounds = array<i64: 80, 40>}, {pipeline_mode = #tpu.pipeline_mode<synchronous>, transform_indices = @transform_8, window_bounds = array<i64: 162, 200>}, {pipeline_mode = #tpu.pipeline_mode<synchronous>, transform_indices = @transform_9, window_bounds = array<i64: 200, 80>}, {pipeline_mode = #tpu.pipeline_mode<synchronous>, transform_indices = @transform_10, window_bounds = array<i64: 16, 256>}, {transform_indices = @transform_11, window_bounds = array<i64: 8, 2>}]} {
    %c0 = arith.constant 0 : index
    %c0_0 = arith.constant 0 : index
    %0 = vector.load %arg1[%c0, %c0_0] : memref<8x18xf32, #tpu.memory_space<vmem>>, vector<8x18xf32>
    %c0_1 = arith.constant 0 : index
    %c0_2 = arith.constant 0 : index
    %1 = vector.load %arg2[%c0_1, %c0_2] : memref<8x18xf32, #tpu.memory_space<vmem>>, vector<8x18xf32>
    %c0_3 = arith.constant 0 : index
    %c0_4 = arith.constant 0 : index
    %2 = vector.load %arg3[%c0_3, %c0_4] : memref<8x18xf32, #tpu.memory_space<vmem>>, vector<8x18xf32>
    %c0_5 = arith.constant 0 : index
    %c0_6 = arith.constant 0 : index
    %c0_7 = arith.constant 0 : index
    %3 = vector.load %arg4[%c0_5, %c0_6, %c0_7] : memref<8x8x18xbf16, #tpu.memory_space<vmem>>, vector<8x8x18xbf16>
    %c0_8 = arith.constant 0 : index
    %c0_9 = arith.constant 0 : index
    %c0_10 = arith.constant 0 : index
    %4 = vector.load %arg5[%c0_8, %c0_9, %c0_10] : memref<8x8x18xbf16, #tpu.memory_space<vmem>>, vector<8x8x18xbf16>
    %c0_11 = arith.constant 0 : index
    %c0_12 = arith.constant 0 : index
    %5 = vector.load %arg6[%c0_11, %c0_12] : memref<8x8xf32, #tpu.memory_space<vmem>>, vector<8x8xf32>
    %c0_13 = arith.constant 0 : index
    %c0_14 = arith.constant 0 : index
    %6 = vector.load %arg11[%c0_13, %c0_14] : memref<16x256xf32, #tpu.memory_space<vmem>>, vector<1x80xf32>
    %c1 = arith.constant 1 : index
    %c0_15 = arith.constant 0 : index
    %7 = vector.load %arg11[%c1, %c0_15] : memref<16x256xf32, #tpu.memory_space<vmem>>, vector<1x40xf32>
    %c2 = arith.constant 2 : index
    %c0_16 = arith.constant 0 : index
    %8 = vector.load %arg11[%c2, %c0_16] : memref<16x256xf32, #tpu.memory_space<vmem>>, vector<1x40xf32>
    %c3 = arith.constant 3 : index
    %c0_17 = arith.constant 0 : index
    %9 = vector.load %arg11[%c3, %c0_17] : memref<16x256xf32, #tpu.memory_space<vmem>>, vector<1x1xf32>
    %c4 = arith.constant 4 : index
    %c0_18 = arith.constant 0 : index
    %10 = vector.load %arg11[%c4, %c0_18] : memref<16x256xf32, #tpu.memory_space<vmem>>, vector<1x200xf32>
    %c5 = arith.constant 5 : index
    %c0_19 = arith.constant 0 : index
    %11 = vector.load %arg11[%c5, %c0_19] : memref<16x256xf32, #tpu.memory_space<vmem>>, vector<1x200xf32>
    %c6 = arith.constant 6 : index
    %c0_20 = arith.constant 0 : index
    %12 = vector.load %arg11[%c6, %c0_20] : memref<16x256xf32, #tpu.memory_space<vmem>>, vector<1x200xf32>
    %c7 = arith.constant 7 : index
    %c0_21 = arith.constant 0 : index
    %13 = vector.load %arg11[%c7, %c0_21] : memref<16x256xf32, #tpu.memory_space<vmem>>, vector<1x200xf32>
    %c8 = arith.constant 8 : index
    %c0_22 = arith.constant 0 : index
    %14 = vector.load %arg11[%c8, %c0_22] : memref<16x256xf32, #tpu.memory_space<vmem>>, vector<1x80xf32>
    %c9 = arith.constant 9 : index
    %c0_23 = arith.constant 0 : index
    %15 = vector.load %arg11[%c9, %c0_23] : memref<16x256xf32, #tpu.memory_space<vmem>>, vector<1x80xf32>
    %c10 = arith.constant 10 : index
    %c0_24 = arith.constant 0 : index
    %16 = vector.load %arg11[%c10, %c0_24] : memref<16x256xf32, #tpu.memory_space<vmem>>, vector<1x80xf32>
    %c11 = arith.constant 11 : index
    %c0_25 = arith.constant 0 : index
    %17 = vector.load %arg11[%c11, %c0_25] : memref<16x256xf32, #tpu.memory_space<vmem>>, vector<1x80xf32>
    %c12 = arith.constant 12 : index
    %c0_26 = arith.constant 0 : index
    %18 = vector.load %arg11[%c12, %c0_26] : memref<16x256xf32, #tpu.memory_space<vmem>>, vector<1x80xf32>
    %19 = arith.truncf %1 : vector<8x18xf32> to vector<8x18xbf16>
    %20 = arith.truncf %2 : vector<8x18xf32> to vector<8x18xbf16>
    %c0_27 = arith.constant 0 : index
    %c0_28 = arith.constant 0 : index
    %c0_29 = arith.constant 0 : index
    %21 = vector.load %arg7[%c0_27, %c0_28, %c0_29] : memref<6x18x80xbf16, #tpu.memory_space<vmem>>, vector<1x18x80xbf16>
    %22 = vector.shape_cast %21 : vector<1x18x80xbf16> to vector<18x80xbf16>
    %cst = arith.constant dense<0.000000e+00> : vector<8x80xf32>
    %23 = tpu.matmul %19, %22, %cst {dimension_numbers = #tpu.dot_dimension_numbers<[1], [0], [0], [1], [0, 0, 1, 1], [], []>} : vector<8x18xbf16>, vector<18x80xbf16>, vector<8x80xf32> -> vector<8x80xf32>
    %c1_30 = arith.constant 1 : index
    %c0_31 = arith.constant 0 : index
    %c0_32 = arith.constant 0 : index
    %24 = vector.load %arg7[%c1_30, %c0_31, %c0_32] : memref<6x18x80xbf16, #tpu.memory_space<vmem>>, vector<1x18x80xbf16>
    %25 = vector.shape_cast %24 : vector<1x18x80xbf16> to vector<18x80xbf16>
    %cst_33 = arith.constant dense<0.000000e+00> : vector<8x80xf32>
    %26 = tpu.matmul %20, %25, %cst_33 {dimension_numbers = #tpu.dot_dimension_numbers<[1], [0], [0], [1], [0, 0, 1, 1], [], []>} : vector<8x18xbf16>, vector<18x80xbf16>, vector<8x80xf32> -> vector<8x80xf32>
    %27 = arith.addf %23, %26 : vector<8x80xf32>
    %28 = vector.shape_cast %3 : vector<8x8x18xbf16> to vector<64x18xbf16>
    %29 = vector.shape_cast %4 : vector<8x8x18xbf16> to vector<64x18xbf16>
    %30 = vector.shape_cast %19 : vector<8x18xbf16> to vector<8x1x18xbf16>
    %31 = vector.broadcast %30 : vector<8x1x18xbf16> to vector<8x8x18xbf16>
    %32 = arith.mulf %3, %31 : vector<8x8x18xbf16>
    %33 = vector.shape_cast %32 : vector<8x8x18xbf16> to vector<64x18xbf16>
    %34 = vector.shape_cast %20 : vector<8x18xbf16> to vector<8x1x18xbf16>
    %35 = vector.broadcast %34 : vector<8x1x18xbf16> to vector<8x8x18xbf16>
    %36 = arith.mulf %4, %35 : vector<8x8x18xbf16>
    %37 = vector.shape_cast %36 : vector<8x8x18xbf16> to vector<64x18xbf16>
    %c2_34 = arith.constant 2 : index
    %c0_35 = arith.constant 0 : index
    %c0_36 = arith.constant 0 : index
    %38 = vector.load %arg7[%c2_34, %c0_35, %c0_36] : memref<6x18x80xbf16, #tpu.memory_space<vmem>>, vector<1x18x80xbf16>
    %39 = vector.shape_cast %38 : vector<1x18x80xbf16> to vector<18x80xbf16>
    %cst_37 = arith.constant dense<0.000000e+00> : vector<64x80xf32>
    %40 = tpu.matmul %28, %39, %cst_37 {dimension_numbers = #tpu.dot_dimension_numbers<[1], [0], [0], [1], [0, 0, 1, 1], [], []>} : vector<64x18xbf16>, vector<18x80xbf16>, vector<64x80xf32> -> vector<64x80xf32>
    %c3_38 = arith.constant 3 : index
    %c0_39 = arith.constant 0 : index
    %c0_40 = arith.constant 0 : index
    %41 = vector.load %arg7[%c3_38, %c0_39, %c0_40] : memref<6x18x80xbf16, #tpu.memory_space<vmem>>, vector<1x18x80xbf16>
    %42 = vector.shape_cast %41 : vector<1x18x80xbf16> to vector<18x80xbf16>
    %cst_41 = arith.constant dense<0.000000e+00> : vector<64x80xf32>
    %43 = tpu.matmul %29, %42, %cst_41 {dimension_numbers = #tpu.dot_dimension_numbers<[1], [0], [0], [1], [0, 0, 1, 1], [], []>} : vector<64x18xbf16>, vector<18x80xbf16>, vector<64x80xf32> -> vector<64x80xf32>
    %44 = arith.addf %40, %43 : vector<64x80xf32>
    %c4_42 = arith.constant 4 : index
    %c0_43 = arith.constant 0 : index
    %c0_44 = arith.constant 0 : index
    %45 = vector.load %arg7[%c4_42, %c0_43, %c0_44] : memref<6x18x80xbf16, #tpu.memory_space<vmem>>, vector<1x18x80xbf16>
    %46 = vector.shape_cast %45 : vector<1x18x80xbf16> to vector<18x80xbf16>
    %cst_45 = arith.constant dense<0.000000e+00> : vector<64x80xf32>
    %47 = tpu.matmul %33, %46, %cst_45 {dimension_numbers = #tpu.dot_dimension_numbers<[1], [0], [0], [1], [0, 0, 1, 1], [], []>} : vector<64x18xbf16>, vector<18x80xbf16>, vector<64x80xf32> -> vector<64x80xf32>
    %48 = arith.addf %44, %47 : vector<64x80xf32>
    %c5_46 = arith.constant 5 : index
    %c0_47 = arith.constant 0 : index
    %c0_48 = arith.constant 0 : index
    %49 = vector.load %arg7[%c5_46, %c0_47, %c0_48] : memref<6x18x80xbf16, #tpu.memory_space<vmem>>, vector<1x18x80xbf16>
    %50 = vector.shape_cast %49 : vector<1x18x80xbf16> to vector<18x80xbf16>
    %cst_49 = arith.constant dense<0.000000e+00> : vector<64x80xf32>
    %51 = tpu.matmul %37, %50, %cst_49 {dimension_numbers = #tpu.dot_dimension_numbers<[1], [0], [0], [1], [0, 0, 1, 1], [], []>} : vector<64x18xbf16>, vector<18x80xbf16>, vector<64x80xf32> -> vector<64x80xf32>
    %52 = arith.addf %48, %51 : vector<64x80xf32>
    %53 = vector.shape_cast %52 : vector<64x80xf32> to vector<8x8x80xf32>
    %54 = vector.shape_cast %27 : vector<8x80xf32> to vector<8x1x80xf32>
    %55 = vector.broadcast %54 : vector<8x1x80xf32> to vector<8x8x80xf32>
    %56 = arith.addf %53, %55 : vector<8x8x80xf32>
    %57 = vector.shape_cast %6 : vector<1x80xf32> to vector<1x1x80xf32>
    %58 = vector.broadcast %57 : vector<1x1x80xf32> to vector<8x8x80xf32>
    %59 = arith.addf %56, %58 : vector<8x8x80xf32>
    %60 = arith.negf %59 : vector<8x8x80xf32>
    %61 = math.exp %60 : vector<8x8x80xf32>
    %cst_50 = arith.constant 1.000000e+00 : f32
    %62 = vector.broadcast %cst_50 : f32 to vector<8x8x80xf32>
    %63 = arith.addf %62, %61 : vector<8x8x80xf32>
    %64 = arith.divf %62, %63 : vector<8x8x80xf32>
    %65 = vector.shape_cast %64 : vector<8x8x80xf32> to vector<64x80xf32>
    %66 = arith.truncf %65 : vector<64x80xf32> to vector<64x80xbf16>
    %c0_51 = arith.constant 0 : index
    %c0_52 = arith.constant 0 : index
    %67 = vector.load %arg8[%c0_51, %c0_52] : memref<80x40xbf16, #tpu.memory_space<vmem>>, vector<80x40xbf16>
    %cst_53 = arith.constant dense<0.000000e+00> : vector<64x40xf32>
    %68 = tpu.matmul %66, %67, %cst_53 {dimension_numbers = #tpu.dot_dimension_numbers<[1], [0], [0], [1], [0, 0, 1, 1], [], []>} : vector<64x80xbf16>, vector<80x40xbf16>, vector<64x40xf32> -> vector<64x40xf32>
    %69 = vector.broadcast %7 : vector<1x40xf32> to vector<64x40xf32>
    %70 = arith.addf %68, %69 : vector<64x40xf32>
    %71 = arith.negf %70 : vector<64x40xf32>
    %72 = math.exp %71 : vector<64x40xf32>
    %cst_54 = arith.constant 1.000000e+00 : f32
    %73 = vector.broadcast %cst_54 : f32 to vector<64x40xf32>
    %74 = arith.addf %73, %72 : vector<64x40xf32>
    %75 = arith.divf %73, %74 : vector<64x40xf32>
    %76 = vector.broadcast %8 : vector<1x40xf32> to vector<64x40xf32>
    %77 = arith.mulf %75, %76 : vector<64x40xf32>
    %cst_55 = arith.constant dense<0.000000e+00> : vector<64xf32>
    %78 = vector.multi_reduction <add>, %77, %cst_55 [1] : vector<64x40xf32> to vector<64xf32>
    %79 = vector.shape_cast %78 : vector<64xf32> to vector<64x1xf32>
    %80 = vector.broadcast %9 : vector<1x1xf32> to vector<64x1xf32>
    %81 = arith.addf %79, %80 : vector<64x1xf32>
    %82 = vector.shape_cast %81 : vector<64x1xf32> to vector<8x8xf32>
    %cst_56 = arith.constant 0.000000e+00 : f32
    %83 = vector.broadcast %cst_56 : f32 to vector<8x8xf32>
    %84 = arith.cmpf ogt, %5, %83 : vector<8x8xf32>
    %cst_57 = arith.constant -4.2949673E+9 : f32
    %85 = vector.broadcast %cst_57 : f32 to vector<8x8xf32>
    %86 = arith.select %84, %82, %85 : vector<8x8xi1>, vector<8x8xf32>
    %cst_58 = arith.constant dense<0xFF800000> : vector<8xf32>
    %87 = vector.multi_reduction <maximumf>, %86, %cst_58 [1] : vector<8x8xf32> to vector<8xf32>
    %cst_59 = arith.constant 0xFF800000 : f32
    %88 = vector.broadcast %cst_59 : f32 to vector<8xf32>
    %89 = arith.maximumf %88, %87 : vector<8xf32>
    %90 = vector.shape_cast %89 : vector<8xf32> to vector<8x1xf32>
    %91 = vector.broadcast %90 : vector<8x1xf32> to vector<8x8xf32>
    %92 = arith.subf %86, %91 : vector<8x8xf32>
    %93 = math.exp %92 : vector<8x8xf32>
    %cst_60 = arith.constant dense<0.000000e+00> : vector<8xf32>
    %94 = vector.multi_reduction <add>, %93, %cst_60 [1] : vector<8x8xf32> to vector<8xf32>
    %95 = vector.shape_cast %94 : vector<8xf32> to vector<8x1xf32>
    %96 = vector.broadcast %95 : vector<8x1xf32> to vector<8x8xf32>
    %97 = arith.divf %93, %96 : vector<8x8xf32>
    %98 = vector.shape_cast %97 : vector<8x8xf32> to vector<8x1x8xf32>
    %cst_61 = arith.constant 1.000000e+00 : f32
    %99 = vector.broadcast %cst_61 : f32 to vector<8x8xf32>
    %100 = vector.shape_cast %99 : vector<8x8xf32> to vector<8x1x8xf32>
    %101 = tpu.concatenate %98, %100 in 1 : vector<8x1x8xf32>, vector<8x1x8xf32> -> vector<8x2x8xf32>
    %102 = arith.truncf %101 : vector<8x2x8xf32> to vector<8x2x8xbf16>
    "tpu.trace_start"() <{level = 10 : i32, message = "bst,bte->bse"}> : () -> ()
    %cst_62 = arith.constant dense<0.000000e+00> : vector<8x2x18xf32>
    %103 = tpu.matmul %102, %3, %cst_62 {dimension_numbers = #tpu.dot_dimension_numbers<[2], [1], [1], [2], [0, 0, 0, 1, 1, 2], [0], [0]>} : vector<8x2x8xbf16>, vector<8x8x18xbf16>, vector<8x2x18xf32> -> vector<8x2x18xf32>
    %cst_63 = arith.constant dense<0.000000e+00> : vector<8x2x18xf32>
    %104 = tpu.matmul %102, %4, %cst_63 {dimension_numbers = #tpu.dot_dimension_numbers<[2], [1], [1], [2], [0, 0, 0, 1, 1, 2], [0], [0]>} : vector<8x2x8xbf16>, vector<8x8x18xbf16>, vector<8x2x18xf32> -> vector<8x2x18xf32>
    "tpu.trace_stop"() : () -> ()
    %105 = vector.extract_strided_slice %103 {offsets = [0, 0, 0], sizes = [8, 1, 18], strides = [1, 1, 1]} : vector<8x2x18xf32> to vector<8x1x18xf32>
    %106 = vector.shape_cast %105 : vector<8x1x18xf32> to vector<8x18xf32>
    %107 = vector.extract_strided_slice %103 {offsets = [0, 1, 0], sizes = [8, 1, 18], strides = [1, 1, 1]} : vector<8x2x18xf32> to vector<8x1x18xf32>
    %108 = vector.shape_cast %107 : vector<8x1x18xf32> to vector<8x18xf32>
    %109 = vector.extract_strided_slice %104 {offsets = [0, 0, 0], sizes = [8, 1, 18], strides = [1, 1, 1]} : vector<8x2x18xf32> to vector<8x1x18xf32>
    %110 = vector.shape_cast %109 : vector<8x1x18xf32> to vector<8x18xf32>
    %111 = vector.extract_strided_slice %104 {offsets = [0, 1, 0], sizes = [8, 1, 18], strides = [1, 1, 1]} : vector<8x2x18xf32> to vector<8x1x18xf32>
    %112 = vector.shape_cast %111 : vector<8x1x18xf32> to vector<8x18xf32>
    %113 = arith.mulf %1, %108 : vector<8x18xf32>
    %114 = arith.mulf %2, %112 : vector<8x18xf32>
    %115 = tpu.concatenate %0, %1, %2, %108, %112, %113, %114, %106, %110 in 1 : vector<8x18xf32>, vector<8x18xf32>, vector<8x18xf32>, vector<8x18xf32>, vector<8x18xf32>, vector<8x18xf32>, vector<8x18xf32>, vector<8x18xf32>, vector<8x18xf32> -> vector<8x162xf32>
    %c0_64 = arith.constant 0 : index
    %c0_65 = arith.constant 0 : index
    %116 = vector.load %arg9[%c0_64, %c0_65] : memref<162x200xf32, #tpu.memory_space<vmem>>, vector<162x200xf32>
    %cst_66 = arith.constant dense<0.000000e+00> : vector<8x200xf32>
    %117 = tpu.matmul %115, %116, %cst_66 {dimension_numbers = #tpu.dot_dimension_numbers<[1], [0], [0], [1], [0, 0, 1, 1], [], []>} : vector<8x162xf32>, vector<162x200xf32>, vector<8x200xf32> -> vector<8x200xf32>
    %118 = vector.broadcast %10 : vector<1x200xf32> to vector<8x200xf32>
    %119 = arith.addf %117, %118 : vector<8x200xf32>
    %120 = vector.broadcast %11 : vector<1x200xf32> to vector<8x200xf32>
    %121 = arith.mulf %119, %120 : vector<8x200xf32>
    %122 = vector.broadcast %12 : vector<1x200xf32> to vector<8x200xf32>
    %123 = arith.addf %121, %122 : vector<8x200xf32>
    %124 = arith.negf %123 : vector<8x200xf32>
    %125 = math.exp %124 : vector<8x200xf32>
    %cst_67 = arith.constant 1.000000e+00 : f32
    %126 = vector.broadcast %cst_67 : f32 to vector<8x200xf32>
    %127 = arith.addf %126, %125 : vector<8x200xf32>
    %128 = arith.divf %126, %127 : vector<8x200xf32>
    %cst_68 = arith.constant 1.000000e+00 : f32
    %129 = vector.broadcast %cst_68 : f32 to vector<8x200xf32>
    %130 = arith.subf %129, %128 : vector<8x200xf32>
    %131 = vector.broadcast %13 : vector<1x200xf32> to vector<8x200xf32>
    %132 = arith.mulf %130, %131 : vector<8x200xf32>
    %133 = arith.addf %128, %132 : vector<8x200xf32>
    %134 = arith.mulf %119, %133 : vector<8x200xf32>
    %c0_69 = arith.constant 0 : index
    %c0_70 = arith.constant 0 : index
    %135 = vector.load %arg10[%c0_69, %c0_70] : memref<200x80xf32, #tpu.memory_space<vmem>>, vector<200x80xf32>
    %cst_71 = arith.constant dense<0.000000e+00> : vector<8x80xf32>
    %136 = tpu.matmul %134, %135, %cst_71 {dimension_numbers = #tpu.dot_dimension_numbers<[1], [0], [0], [1], [0, 0, 1, 1], [], []>} : vector<8x200xf32>, vector<200x80xf32>, vector<8x80xf32> -> vector<8x80xf32>
    %137 = vector.broadcast %14 : vector<1x80xf32> to vector<8x80xf32>
    %138 = arith.addf %136, %137 : vector<8x80xf32>
    %139 = vector.broadcast %15 : vector<1x80xf32> to vector<8x80xf32>
    %140 = arith.mulf %138, %139 : vector<8x80xf32>
    %141 = vector.broadcast %16 : vector<1x80xf32> to vector<8x80xf32>
    %142 = arith.addf %140, %141 : vector<8x80xf32>
    %143 = arith.negf %142 : vector<8x80xf32>
    %144 = math.exp %143 : vector<8x80xf32>
    %cst_72 = arith.constant 1.000000e+00 : f32
    %145 = vector.broadcast %cst_72 : f32 to vector<8x80xf32>
    %146 = arith.addf %145, %144 : vector<8x80xf32>
    %147 = arith.divf %145, %146 : vector<8x80xf32>
    %cst_73 = arith.constant 1.000000e+00 : f32
    %148 = vector.broadcast %cst_73 : f32 to vector<8x80xf32>
    %149 = arith.subf %148, %147 : vector<8x80xf32>
    %150 = vector.broadcast %17 : vector<1x80xf32> to vector<8x80xf32>
    %151 = arith.mulf %149, %150 : vector<8x80xf32>
    %152 = arith.addf %147, %151 : vector<8x80xf32>
    %153 = arith.mulf %138, %152 : vector<8x80xf32>
    %154 = vector.broadcast %18 : vector<1x80xf32> to vector<8x80xf32>
    %155 = arith.mulf %153, %154 : vector<8x80xf32>
    %cst_74 = arith.constant dense<0.000000e+00> : vector<8xf32>
    %156 = vector.multi_reduction <add>, %155, %cst_74 [1] : vector<8x80xf32> to vector<8xf32>
    %157 = vector.shape_cast %156 : vector<8xf32> to vector<8x1xf32>
    %158 = arith.negf %157 : vector<8x1xf32>
    %159 = math.exp %158 : vector<8x1xf32>
    %cst_75 = arith.constant 1.000000e+00 : f32
    %160 = vector.broadcast %cst_75 : f32 to vector<8x1xf32>
    %161 = arith.addf %160, %159 : vector<8x1xf32>
    %162 = arith.divf %160, %161 : vector<8x1xf32>
    %cst_76 = arith.constant 1.000000e+00 : f32
    %163 = vector.broadcast %cst_76 : f32 to vector<8x1xf32>
    %164 = arith.subf %163, %162 : vector<8x1xf32>
    %165 = tpu.concatenate %164, %162 in 1 : vector<8x1xf32>, vector<8x1xf32> -> vector<8x2xf32>
    %c0_77 = arith.constant 0 : index
    %c0_78 = arith.constant 0 : index
    %166 = vector.load %arg12[%c0_77, %c0_78] : memref<8x2xf32, #tpu.memory_space<vmem>>, vector<8x2xf32>
    tpu.vector_store %arg12[%c0_77, %c0_78], %165 {strides = array<i32>} : memref<8x2xf32, #tpu.memory_space<vmem>>, vector<8x2xf32>,
    return
  }
  func.func @transform_0(%arg0: i32) -> (i32, i32) {
    %c0_i32 = arith.constant 0 : i32
    %c0_i32_0 = arith.constant 0 : i32
    return %arg0, %c0_i32 : i32, i32
  }
  func.func @transform_1(%arg0: i32) -> (i32, i32) {
    %c0_i32 = arith.constant 0 : i32
    %c0_i32_0 = arith.constant 0 : i32
    return %arg0, %c0_i32 : i32, i32
  }
  func.func @transform_2(%arg0: i32) -> (i32, i32) {
    %c0_i32 = arith.constant 0 : i32
    %c0_i32_0 = arith.constant 0 : i32
    return %arg0, %c0_i32 : i32, i32
  }
  func.func @transform_3(%arg0: i32) -> (i32, i32, i32) {
    %c0_i32 = arith.constant 0 : i32
    %c0_i32_0 = arith.constant 0 : i32
    %c0_i32_1 = arith.constant 0 : i32
    return %arg0, %c0_i32, %c0_i32_0 : i32, i32, i32
  }
  func.func @transform_4(%arg0: i32) -> (i32, i32, i32) {
    %c0_i32 = arith.constant 0 : i32
    %c0_i32_0 = arith.constant 0 : i32
    %c0_i32_1 = arith.constant 0 : i32
    return %arg0, %c0_i32, %c0_i32_0 : i32, i32, i32
  }
  func.func @transform_5(%arg0: i32) -> (i32, i32) {
    %c0_i32 = arith.constant 0 : i32
    %c0_i32_0 = arith.constant 0 : i32
    return %arg0, %c0_i32 : i32, i32
  }
  func.func @transform_6(%arg0: i32) -> (i32, i32, i32) {
    %c0_i32 = arith.constant 0 : i32
    %c0_i32_0 = arith.constant 0 : i32
    %c0_i32_1 = arith.constant 0 : i32
    %c0_i32_2 = arith.constant 0 : i32
    return %c0_i32, %c0_i32_0, %c0_i32_1 : i32, i32, i32
  }
  func.func @transform_7(%arg0: i32) -> (i32, i32) {
    %c0_i32 = arith.constant 0 : i32
    %c0_i32_0 = arith.constant 0 : i32
    %c0_i32_1 = arith.constant 0 : i32
    return %c0_i32, %c0_i32_0 : i32, i32
  }
  func.func @transform_8(%arg0: i32) -> (i32, i32) {
    %c0_i32 = arith.constant 0 : i32
    %c0_i32_0 = arith.constant 0 : i32
    %c0_i32_1 = arith.constant 0 : i32
    return %c0_i32, %c0_i32_0 : i32, i32
  }
  func.func @transform_9(%arg0: i32) -> (i32, i32) {
    %c0_i32 = arith.constant 0 : i32
    %c0_i32_0 = arith.constant 0 : i32
    %c0_i32_1 = arith.constant 0 : i32
    return %c0_i32, %c0_i32_0 : i32, i32
  }
  func.func @transform_10(%arg0: i32) -> (i32, i32) {
    %c0_i32 = arith.constant 0 : i32
    %c0_i32_0 = arith.constant 0 : i32
    %c0_i32_1 = arith.constant 0 : i32
    return %c0_i32, %c0_i32_0 : i32, i32
  }
  func.func @transform_11(%arg0: i32) -> (i32, i32) {
    %c0_i32 = arith.constant 0 : i32
    %c0_i32_0 = arith.constant 0 : i32
    return %arg0, %c0_i32 : i32, i32
  }
}

</mosaic_0001>

<bundles_post_ra>
// kernel: din_forward.1
= control target key start
LH: loop header
LB: loop body
LE: loop exit
PB: predicated region body
PF: predicated region fallthrough
CT: control target
= control target key end

     0   :  { %s3885_s17 = smov 0   ;;  %s4653_s0 = inlined_call_operand.vmem [shape: f32[16,18], index: 0, kind: input, shape index: {}]   ;;  %s4654_s1 = inlined_call_operand.vmem [shape: f32[16,18], index: 1, kind: input, shape index: {}]   ;;  %s4655_s2 = inlined_call_operand.vmem [shape: f32[16,18], index: 2, kind: input, shape index: {}]   ;;  %s4656_s3 = inlined_call_operand.vmem [shape: bf16[16,8,18], index: 3, kind: input, shape index: {}]   ;;  %s4657_s4 = inlined_call_operand.vmem [shape: bf16[16,8,18], index: 4, kind: input, shape index: {}]   ;;  %s4658_s5 = inlined_call_operand.vmem [shape: f32[16,8], index: 5, kind: input, shape index: {}]   ;;  %s4659_s6 = inlined_call_operand.vmem [shape: bf16[6,18,80], index: 6, kind: input, shape index: {}]   ;;  %s4660_s7 = inlined_call_operand.vmem [shape: bf16[80,40], index: 7, kind: input, shape index: {}]   ;;  %s4661_s8 = inlined_call_operand.vmem [shape: f32[162,200], index: 8, kind: input, shape index: {}]   ;;  %s4662_s9 = inlined_call_operand.vmem [shape: f32[200,80], index: 9, kind: input, shape index: {}]   ;;  %s4663_s10 = inlined_call_operand.vmem [shape: f32[16,256], index: 10, kind: input, shape index: {}]   ;;  %s4664_s11 = inlined_call_operand.vmem [shape: f32[16,2], index: 11, kind: output, shape index: {}]  }
   0x1 LB: > { %s3891_s18 = sadd.s32 4294967295, %s3810_s17   ;;  %p3178_p0 = scmp.ge.s32.totalorder %s3810_s17, 1  ;;  %s3810_s17 = sphi %s3885_s17, %s21_s17  }
   0x2   : > { %p385_p1 = scmp.lt.s32.totalorder %s3810_s17, 3 }
   0x4   : > { %p386_p2 = pnand %p3178_p0, %p385_p1 }
   0x5   : > { %v3689_v0 = vld [vmem:[%s4659_s6 + $0xc] sm:$0xff] (!%p386_p2)   ;;  %v640_v1 = vlaneseq (!%p386_p2)  ;;  %v3812_v2 = vmov (!%p386_p2), 0.0   ;;  %v3690_v3 = vld [vmem:[%s4659_s6] sm:$0xff] (!%p386_p2)   ;;  %vm537_vm0 = vcmask (!%p386_p2), 1040384   ;;  %p445_p3 = scmp.lt.s32.totalorder (!%p386_p2), %s3891_s18, 1  ;;  %vm3813_vm1 = vmmov (!%p386_p2), 0  }
   0x6   : > { %389 = sbr.rel (%p386_p2) target bundleno = 2261 (0x8d5), region = 64  ;;  %3383 = vmatprep.subr.bf16.mxu1 (!%p386_p2), %v3812_v2  ;;  %3391 = vmatprep.subr.bf16.mxu0 (!%p386_p2), %v3812_v2  ;;  %v3691_v4 = vld [vmem:[%s4659_s6 + $0x14] ss:$0 sps:$4 sm:$0x11] (!%p386_p2)   ;;  %v3693_v8 = vld [vmem:[%s4659_s6 + $0x18] sm:$0xff] (!%p386_p2)   ;;  %s3182_s14 = sshll.u32 (!%p386_p2), %s3891_s18, 3 }
   0x7   : > { %3384 = vmatpush3.bf16.msra.mxu1 (!%p386_p2), %v3689_v0  ;;  %3392 = vmatpush3.bf16.msra.mxu0 (!%p386_p2), %v3690_v3  ;;  %v3692_v5 = vld [vmem:[%s4659_s6 + $0x8] ss:$0 sps:$4 sm:$0x11] (!%p386_p2)   ;;  %v539_v6 = vsel (!%p386_p2), %vm537_vm0, %v3691_v4, 0  ;;  %v3916_v7 = vshrl.u32 (!%p386_p2), %v640_v1, 7  ;;  %vm533_vm2 = vcmask (!%p386_p2), 146432  }
   0x8   : > { %3385 = vmatprep.subr.bf16.mxu1 (!%p386_p2), %v3812_v2  ;;  %3393 = vmatprep.subr.bf16.mxu0 (!%p386_p2), %v3812_v2  ;;  %v594_v9 = vsel (!%p386_p2), %vm537_vm0, %v3692_v5, 0  ;;  %v3814_v10 = vmov (!%p386_p2), 1966171168   ;;  %v3694_v12 = vld [vmem:[%s4659_s6 + $0x20] ss:$0 sps:$4 sm:$0x11] (!%p386_p2)  }
   0x9   : > { %3387 = vmatprep.mubr.msk.bf16.mxu1 (!%p386_p2), %vm3813_vm1, %v3812_v2  ;;  %v638_v11 = vunpack.c.l.s4 (!%p386_p2), %v3814_v10  ;;  %3395 = vmatprep.mubr.msk.bf16.mxu0 (!%p386_p2), %vm3813_vm1, %v3812_v2  ;;  %p458_p4 = scmp.lt.s32.totalorder (!%p386_p2), %s3182_s14, 15  ;;  %v3950_v16 = vld [vmem:[%s4659_s6 + $0x38] ss:$0 sps:$4 sm:$0x11] (!%p386_p2)   ;;  %v3702_v20 = vld [vmem:[%s4659_s6 + $0x24] sm:$0xff] (!%p386_p2)   ;;  %v3960_v21 = vsub.s32 (!%p386_p2), 0, %v3916_v7 }
   0xa   : > { %v1069_v23 = vsel (!%p386_p2), %vm537_vm0, %v3694_v12, 0  ;;  %v3704_v25 = vld [vmem:[%s4659_s6 + $0x2c] ss:$0 sps:$4 sm:$0x11] (!%p386_p2)   ;;  %v3697_v28 = vld [vmem:[%s4659_s6 + $0x30] sm:$0xff] (!%p386_p2)   ;;  %v1182_v29 = vsel (!%p386_p2), %vm537_vm0, %v3950_v16, 0 }
   0xb   : > { %3386 = vmatpush3.bf16.msra.mxu1 (!%p386_p2), %v539_v6  ;;  %3394 = vmatpush3.bf16.msra.mxu0 (!%p386_p2), %v594_v9  ;;  %v639_v13 = vunpack.c.0.s8 (!%p386_p2), %v638_v11  ;;  %v4049_v63 = vld [vmem:[%s4659_s6 + $0x3c] sm:$0xff] (!%p386_p2)   ;;  %v960_v0 = vsel (!%p386_p2), %vm537_vm0, %v3704_v25, 0  ;;  %vm1576_vm3 = vcmask (!%p386_p2), 654336   ;;  %vm1710_vm4 = vcmask (!%p386_p2), 326656   ;;  %s3818_s25 = smov (!%p386_p2), 54   ;;  %s3823_s30 = smov (!%p386_p2), 108  }
   0xc   : > { %3411 = vmatprep.subr.bf16.mxu1 (!%p386_p2), %v3693_v8  ;;  %3399 = vmatprep.subr.bf16.mxu0 (!%p386_p2), %v3702_v20  ;;  %vm1810_vm5 = vcmask (!%p386_p2), 1041409   ;;  %vm1812_vm6 = vcmask (!%p386_p2), 1042434   ;;  %vm1814_vm7 = vcmask (!%p386_p2), 1043459   ;;  %vm1816_vm8 = vcmask (!%p386_p2), 1044484   ;;  %s3824_s15 = smov (!%p386_p2), 16  }
   0xd   : > { %s446_s29 = scalar_select %p445_p3, %s3891_s18, 1  ;;  %v3939_v15 = vsub.s32 %v639_v13, %v3916_v7  ;;  %vm1818_vm9 = vcmask 1045509   ;;  %vm1820_vm10 = vcmask 1046534   ;;  %vm1822_vm11 = vcmask 1047559  }
   0xe   : > { %s4666_s14 = smov (!%p458_p4, %s3182_s14), 15  ;;  %vm1826_vm13 = vcmask 64512   ;;  %vm1915_vm14 = vcmask 1043456   ;;  %vm2801_vm15 = vcmask 1041408  }
   0xf   : > { %s3928_s13 = sshll.u32 %s446_s29, 3  ;;  %s3183_s26 = sshll.u32 %s4666_s14, 2 }
  0x10   : > { %s3935_s19 = scalar_lea.vmem %s4655_s2, %s3928_s13  ;;  %s3945_s22 = scalar_lea.vmem %s4654_s1, %s3928_s13 }
  0x11   : > { %v480_v14 = vld [vmem:[%s3935_s19] sm:$0xff]  ;;  %s3977_s12 = scalar_lea.vmem %s4656_s3, %s3183_s26  ;;  %s4012_s21 = scalar_lea.vmem %s4657_s4, %s3183_s26 }
  0x12   : > { %v516_v17 = vpack.c.bf16 %v480_v14, %v480_v14  ;;  %v479_v18 = vld [vmem:[%s3945_s22] sm:$0xff]  ;;  %v3992_v34 = vld [vmem:[%s3977_s12 + $0x8] sm:$0xf]  ;;  %v4000_v37 = vld [vmem:[%s3977_s12 + $0xc] sm:$0xf]  ;;  %s472_s14 = scalar_lea.vmem %s4658_s5, %s3928_s13  ;;  %s3820_s26 = smov 126  }
  0x13   : > { %v515_v19 = vpack.c.bf16 %v479_v18, %v479_v18  ;;  %v3986_v32 = vld [vmem:[%s3977_s12] sm:$0xf]  ;;  %v3989_v33 = vld [vmem:[%s3977_s12 + $0x4] sm:$0xf]  ;;  %v4003_v38 = vld [vmem:[%s3977_s12 + $0x10] sm:$0xf]  ;;  %v3226_v43 = vcombine.low %v3992_v34, %v4000_v37 }
  0x14   : > { %3388 = vmatmul.mubr.msk.bf16.vlgmr.msra.gmra.mrb[0].mxu1 %vm533_vm2, %v516_v17  ;;  %v780_v22 = vrot.slane %v516_v17, %v3939_v15  ;;  %v3225_v36 = vcombine.low %v3986_v32, %v3989_v33  ;;  %v4006_v39 = vld [vmem:[%s3977_s12 + $0x14] sm:$0xf]  ;;  %v4018_v44 = vld [vmem:[%s3977_s12 + $0x18] sm:$0xf]  ;;  %v4021_v45 = vld [vmem:[%s3977_s12 + $0x1c] sm:$0xf] }
  0x15   : > { %3396 = vmatmul.mubr.msk.bf16.vlgmr.msra.gmra.mrb[0].mxu0 %vm533_vm2, %v515_v19  ;;  %v643_v24 = vrot.slane %v515_v19, %v3939_v15  ;;  %3412 = vmatpush3.bf16.msra.mxu1 %v3693_v8  ;;  %v3227_v49 = vcombine.low %v4003_v38, %v4006_v39  ;;  %v4033_v54 = vld [vmem:[%s4012_s21] sm:$0xf]  ;;  %v3228_v56 = vcombine.low %v4018_v44, %v4021_v45  ;;  %v4041_v59 = vld [vmem:[%s4012_s21 + $0x4] sm:$0xf]  ;;  %s3822_s29 = smov 72  }
  0x16   : > { %v781_v26 = vcombine.high %v780_v22, %v780_v22  ;;  %v3971_v27 = vrot.slane %v780_v22, %v3939_v15  ;;  %3663 = vmatprep.subr.msk.bf16.mxu1 %vm537_vm0, %v3694_v12  ;;  %3400 = vmatpush3.bf16.msra.mxu0 %v3702_v20  ;;  %v3215_v17 = vcombine.low %v4033_v54, %v4041_v59 }
  0x17   : > { %v644_v30 = vcombine.high %v643_v24, %v643_v24  ;;  %v651_v31 = vrot.slane %v643_v24, %v3939_v15  ;;  %3662 = vmatprep.subr.msk.bf16.mxu0 %vm537_vm0, %v3704_v25  ;;  %3415 = vmatprep.mubr.msk.bf16.mxu1 %vm533_vm2, %v3225_v36  ;;  %v4073_v36 = vld [vmem:[%s4012_s21 + $0xc] sm:$0xf] }
  0x18   : > { %v3995_v35 = vrot.slane %v781_v26, %v3939_v15  ;;  %v4025_v46 = vcombine.high %v3971_v27, %v3971_v27  ;;  %v799_v47 = vunpack.i.h.s16 %v3971_v27  ;;  %3403 = vmatprep.mubr.msk.bf16.mxu0 %vm533_vm2, %v3215_v17 }
  0x19   : > { %v658_v40 = vrot.slane %v644_v30, %v3939_v15  ;;  %v659_v41 = vcombine.high %v651_v31, %v651_v31  ;;  %v662_v42 = vunpack.i.h.s16 %v651_v31  ;;  %3414 = vmatpush3.bf16.msra.mxu1 %v1069_v23  ;;  %v3201_v52 = vpack.i.b16 %v651_v31, %v651_v31 }
  0x1a   : > { %v801_v48 = vunpack.i.h.s16 %v3995_v35  ;;  %3423 = vmatprep.subr.bf16.mxu1 %v3697_v28  ;;  %v3206_v55 = vpack.i.b16 %v3995_v35, %v3995_v35  ;;  %3402 = vmatpush3.bf16.msra.mxu0 %v960_v0  ;;  %v4102_v0 = vld [vmem:[%s4012_s21 + $0x1c] sm:$0xf] }
  0x1b   : > { %v664_v50 = vunpack.i.h.s16 %v658_v40  ;;  %v3202_v51 = vpack.i.b16 %v658_v40, %v658_v40  ;;  %v670_v53 = vpack.i.b16 %v662_v42, %v662_v42  ;;  %v666_v57 = vunpack.i.h.s16 %v659_v41 }
  0x1c   : > { %3416 = vmatmul.mubr.msk.bf16.vlgmr.msra.gmra.mrb[4].mxu1 %vm533_vm2, %v3226_v43  ;;  %v3203_v58 = vpack.i.b16 %v659_v41, %v659_v41  ;;  %v680_v62 = vrot.slane %v3201_v52, %v3960_v21  ;;  %v809_v3 = vpack.i.b16 %v801_v48, %v801_v48  ;;  %v660_v11 = vcombine.high %v658_v40, %v658_v40 }
  0x1d   : > { %v672_v60 = vpack.i.b16 %v664_v50, %v664_v50  ;;  %v688_v61 = vrot.slane %v3202_v51, %v3960_v21  ;;  %3424 = vmatpush3.bf16.msra.mxu1 %v3697_v28  ;;  %3419 = vmatprep.mubr.msk.bf16.mxu1 %vm533_vm2, %v3227_v49  ;;  %v684_v4 = vrot.slane %v670_v53, %v3960_v21 }
  0x1e   : > { %3664 = vmatprep.subr.msk.bf16.mxu1 %vm537_vm0, %v3950_v16  ;;  %v674_v5 = vpack.i.b16 %v666_v57, %v666_v57  ;;  %v696_v6 = vrot.slane %v3203_v58, %v3960_v21  ;;  %v710_v10 = vpack.i.b16 %v680_v62, %v680_v62  ;;  %v668_v20 = vunpack.i.h.s16 %v660_v11  ;;  %v4088_v57 = vld [vmem:[%s4012_s21 + $0x10] sm:$0xf]  ;;  %v4091_v58 = vld [vmem:[%s4012_s21 + $0x14] sm:$0xf]  ;;  %v4099_v62 = vld [vmem:[%s4012_s21 + $0x18] sm:$0xf] }
  0x1f   : > { %v692_v8 = vrot.slane %v672_v60, %v3960_v21  ;;  %v724_v9 = vpack.i.b16 %v688_v61, %v688_v61  ;;  %v717_v12 = vpack.i.b16 %v684_v4, %v684_v4  ;;  %v3204_v25 = vpack.i.b16 %v660_v11, %v660_v11 }
  0x20   : > { %v700_v13 = vrot.slane %v674_v5, %v3960_v21  ;;  %v738_v14 = vpack.i.b16 %v696_v6, %v696_v6  ;;  %v715_v19 = vrot.slane %v710_v10, %v3960_v21  ;;  %v825_v26 = vrot.slane %v3206_v55, %v3960_v21  ;;  %v3703_v6 = vld [vmem:[%s4659_s6 + $0x44] ss:$0 sps:$4 sm:$0x11]  }
  0x21   : > { %v729_v16 = vrot.slane %v724_v9, %v3960_v21  ;;  %v731_v18 = vpack.i.b16 %v692_v8, %v692_v8  ;;  %3426 = vmatpush3.bf16.msra.mxu1 %v1182_v29  ;;  %v722_v22 = vrot.slane %v717_v12, %v3960_v21  ;;  %v676_v31 = vpack.i.b16 %v668_v20, %v668_v20  ;;  %v4070_v29 = vld [vmem:[%s4012_s21 + $0x8] sm:$0xf] }
  0x22   : > { %3435 = vmatprep.subr.bf16.mxu1 %v4049_v63  ;;  %v743_v23 = vrot.slane %v738_v14, %v3960_v21  ;;  %v745_v24 = vpack.i.b16 %v700_v13, %v700_v13  ;;  %v765_v30 = vmul.bf16 %v715_v19, %v3986_v32  ;;  %v704_v43 = vrot.slane %v3204_v25, %v3960_v21 }
  0x23   : > { %v736_v28 = vrot.slane %v731_v18, %v3960_v21  ;;  %v767_v40 = vmul.bf16 %v729_v16, %v3992_v34  ;;  %v766_v41 = vmul.bf16 %v722_v22, %v3989_v33  ;;  %v829_v48 = vrot.slane %v809_v3, %v3960_v21 }
  0x24   : > { %3420 = vmatmul.mubr.msk.bf16.gmra.mrb[8].mxu1 %vm533_vm2, %v3228_v56  ;;  %v750_v42 = vrot.slane %v745_v24, %v3960_v21  ;;  %v769_v50 = vmul.bf16 %v743_v23, %v4003_v38  ;;  %v708_v51 = vrot.slane %v676_v31, %v3960_v21  ;;  %v752_v53 = vpack.i.b16 %v704_v43, %v704_v43 }
  0x25   : > { %v768_v49 = vmul.bf16 %v736_v28, %v4000_v37  ;;  %v3238_v52 = vcombine.low %v765_v30, %v766_v41  ;;  %v3216_v55 = vcombine.low %v4070_v29, %v4073_v36  ;;  %v3205_v38 = vpack.i.b16 %v3971_v27, %v3971_v27 }
  0x26   : > { %v770_v34 = vmul.bf16 %v750_v42, %v4006_v39  ;;  %v759_v56 = vpack.i.b16 %v708_v51, %v708_v51  ;;  %v757_v61 = vrot.slane %v752_v53, %v3960_v21  ;;  %v803_v3 = vunpack.i.h.s16 %v4025_v46 }
  0x27   : > { %3427 = vmatprep.mubr.msk.bf16.mxu1 %vm533_vm2, %v3238_v52  ;;  %v3239_v60 = vcombine.low %v767_v40, %v768_v49  ;;  %3404 = vmatmul.mubr.msk.bf16.vlgmr.msra.gmra.mrb[4].mxu0 %vm533_vm2, %v3216_v55  ;;  %v861_v8 = vpack.i.b16 %v825_v26, %v825_v26  ;;  %v807_v9 = vpack.i.b16 %v799_v47, %v799_v47  ;;  %v1303_v19 = vsel %vm537_vm0, %v3703_v6, 0 }
  0x28   : > { %v3240_v4 = vcombine.low %v769_v50, %v770_v34  ;;  %v764_v5 = vrot.slane %v759_v56, %v3960_v21  ;;  %v771_v10 = vmul.bf16 %v757_v61, %v4018_v44  ;;  %v868_v11 = vpack.i.b16 %v829_v48, %v829_v48 }
  0x29   : > { %v817_v12 = vrot.slane %v3205_v38, %v3960_v21  ;;  %v3217_v13 = vcombine.low %v4088_v57, %v4091_v58  ;;  %v821_v17 = vrot.slane %v807_v9, %v3960_v21  ;;  %v3218_v16 = vcombine.low %v4099_v62, %v4102_v0  ;;  %v3710_v9 = vld [vmem:[%s4660_s7 + $0x8] sm:$0xff]  }
  0x2a   : > { %v772_v14 = vmul.bf16 %v764_v5, %v4021_v45  ;;  %v3207_v27 = vpack.i.b16 %v4025_v46, %v4025_v46  ;;  %v811_v44 = vpack.i.b16 %v803_v3, %v803_v3  ;;  %v797_v18 = vcombine.high %v3995_v35, %v3995_v35 }
  0x2b   : > { %v847_v47 = vpack.i.b16 %v817_v12, %v817_v12  ;;  %3407 = vmatprep.mubr.msk.bf16.mxu0 %vm533_vm2, %v3217_v13  ;;  %v866_v20 = vrot.slane %v861_v8, %v3960_v21  ;;  %v854_v22 = vpack.i.b16 %v821_v17, %v821_v17  ;;  %v3709_v8 = vld [vmem:[%s4660_s7] sm:$0xff]  }
  0x2c   : > { %3428 = vmatmul.mubr.msk.bf16.vlgmr.msra.gmra.mrb[4].mxu1 %vm533_vm2, %v3239_v60  ;;  %v833_v46 = vrot.slane %v3207_v27, %v3960_v21  ;;  %v837_v24 = vrot.slane %v811_v44, %v3960_v21  ;;  %v805_v25 = vunpack.i.h.s16 %v797_v18  ;;  %v3208_v26 = vpack.i.b16 %v797_v18, %v797_v18  ;;  %3447 = vmatprep.subr.bf16.mxu0 %v3709_v8  ;;  %v3713_v12 = vld [vmem:[%s4660_s7 + $0x20] sm:$0xff]  }
  0x2d   : > { %3436 = vmatpush3.bf16.msra.mxu1 %v4049_v63  ;;  %3431 = vmatprep.mubr.msk.bf16.mxu1 %vm533_vm2, %v3240_v4  ;;  %v852_v23 = vrot.slane %v847_v47, %v3960_v21  ;;  %v3241_v35 = vcombine.low %v771_v10, %v772_v14  ;;  %v873_v63 = vrot.slane %v868_v11, %v3960_v21  ;;  %v3711_v10 = vld [vmem:[%s4660_s7 + $0x10] sm:$0xff]   ;;  %v3712_v11 = vld [vmem:[%s4660_s7 + $0x18] sm:$0xff]  }
  0x2e   : > { %3665 = vmatprep.subr.msk.bf16.mxu1 %vm537_vm0, %v3703_v6  ;;  %v859_v28 = vrot.slane %v854_v22, %v3960_v21  ;;  %v875_v30 = vpack.i.b16 %v833_v46, %v833_v46  ;;  %v882_v40 = vpack.i.b16 %v837_v24, %v837_v24  ;;  %v813_v41 = vpack.i.b16 %v805_v25, %v805_v25 }
  0x2f   : > { %v902_v31 = vmul.bf16 %v852_v23, %v4033_v54  ;;  %3408 = vmatmul.mubr.msk.bf16.gmra.mrb[8].mxu0 %vm533_vm2, %v3218_v16  ;;  %v841_v42 = vrot.slane %v3208_v26, %v3960_v21  ;;  %v904_v54 = vmul.bf16 %v866_v20, %v4070_v29  ;;  %v905_v52 = vmul.bf16 %v873_v63, %v4073_v36 }
  0x30   : > { %v903_v43 = vmul.bf16 %v859_v28, %v4041_v59  ;;  %v880_v48 = vrot.slane %v875_v30, %v3960_v21  ;;  %v887_v49 = vrot.slane %v882_v40, %v3960_v21  ;;  %v845_v50 = vrot.slane %v813_v41, %v3960_v21  ;;  %3448 = vmatpush3.bf16.msra.mxu0 %v3709_v8 }
  0x31   : > { %3438 = vmatpush3.bf16.msra.mxu1 %v1303_v19  ;;  %v889_v34 = vpack.i.b16 %v841_v42, %v841_v42  ;;  %v3252_v60 = vcombine.low %v904_v54, %v905_v52  ;;  %3449 = vmatprep.subr.bf16.mxu0 %v3710_v9 }
  0x32   : > { %3483 = vmatprep.subr.bf16.mxu1 %v3812_v2  ;;  %v3251_v51 = vcombine.low %v902_v31, %v903_v43  ;;  %v896_v53 = vpack.i.b16 %v845_v50, %v845_v50  ;;  %v906_v55 = vmul.bf16 %v880_v48, %v4088_v57  ;;  %v907_v56 = vmul.bf16 %v887_v49, %v4091_v58 }
  0x33   : > { %v894_v61 = vrot.slane %v889_v34, %v3960_v21  ;;  %v498_v34 = vld [vmem:[%s4663_s10] ss:$0 sm:$0xff] }
  0x34   : > { %3432 = vmatmul.mubr.msk.bf16.gmra.mrb[8].mxu1 %vm533_vm2, %v3241_v35  ;;  %v901_v38 = vrot.slane %v896_v53, %v3960_v21  ;;  %v3253_v3 = vcombine.low %v906_v55, %v907_v56  ;;  %3450 = vmatpush3.bf16.msra.mxu0 %v3710_v9 }
  0x35   : > { %3439 = vmatprep.mubr.msk.bf16.mxu1 %vm533_vm2, %v3251_v51  ;;  %v908_v4 = vmul.bf16 %v894_v61, %v4099_v62  ;;  %3451 = vmatprep.subr.bf16.mxu0 %v3711_v10 }
  0x36   : > { %v909_v5 = vmul.bf16 %v901_v38, %v4102_v0 }
  0x38   : > { %v3254_v6 = vcombine.low %v908_v4, %v909_v5  ;;  %3452 = vmatpush3.bf16.msra.mxu0 %v3711_v10 }
  0x39   : > { %3453 = vmatprep.subr.bf16.mxu0 %v3712_v11 }
  0x3c   : > { %3440 = vmatmul.mubr.msk.bf16.vlgmr.msra.gmra.mrb[4].mxu1 %vm533_vm2, %v3252_v60  ;;  %3454 = vmatpush3.bf16.msra.mxu0 %v3712_v11 }
  0x3d   : > { %3443 = vmatprep.mubr.msk.bf16.mxu1 %vm533_vm2, %v3253_v3  ;;  %3455 = vmatprep.subr.bf16.mxu0 %v3713_v12 }
  0x40   : > { %3456 = vmatpush3.bf16.msra.mxu0 %v3713_v12 }
  0x41   : > { %3465 = vmatprep.subr.bf16.mxu0 %v3812_v2 }
  0x44   : > { %3444 = vmatmul.mubr.msk.bf16.gmra.mrb[8].mxu1 %vm533_vm2, %v3254_v6 }
  0x45   : > { %3485 = vmatprep.mubr.msk.bf16.mxu1 %vm3813_vm1, %v3812_v2 }
  0xe7   : > { %v575_v13 = vpop.f32.mrb[0].mxu1 }
  0xe8   : > { %v3389_v14 = vpop.f32.mrb[1].mxu1  ;;  %v630_v17 = vpop.f32.mrb[0].mxu0 }
  0xe9   : > { %v631_v16 = vadd.f32 %v630_v17, %v575_v13  ;;  %v578_v27 = vpop.f32.mrb[2].mxu1  ;;  %v3397_v47 = vpop.f32.mrb[1].mxu0 }
  0xea   : > { %v3390_v44 = vpop.f32.mrb[3].mxu1  ;;  %v633_v18 = vpop.f32.mrb[2].mxu0 }
  0xeb   : > { %v3398_v19 = vpop.f32.mrb[3].mxu0  ;;  %v1386_v24 = vrot.slane %v631_v16, %v3939_v15  ;;  %v1379_v63 = vcombine.high %v631_v16, %v631_v16 }
  0xed   : > { %v1394_v28 = vcombine.high %v1386_v24, %v1386_v24  ;;  %v1402_v31 = vrot.slane %v1386_v24, %v3939_v15  ;;  %v1393_v40 = vrot.slane %v1379_v63, %v3939_v15 }
  0xef   : > { %v1416_v41 = vrot.slane %v1394_v28, %v3939_v15  ;;  %v1424_v42 = vcombine.high %v1402_v31, %v1402_v31  ;;  %v1395_v43 = vcombine.high %v1393_v40, %v1393_v40  ;;  %v1409_v50 = vrot.slane %v1393_v40, %v3939_v15 }
  0xf0   : > { %v1431_v55 = vrot.slane %v1402_v31, %v3960_v21 }
  0xf1   : > { %v1426_v48 = vcombine.high %v1416_v41, %v1416_v41  ;;  %v1439_v54 = vrot.slane %v1424_v42, %v3960_v21  ;;  %v1423_v4 = vrot.slane %v1395_v43, %v3939_v15  ;;  %v1435_v8 = vrot.slane %v1416_v41, %v3960_v21 }
  0xf2   : > { %v1425_v11 = vcombine.high %v1409_v50, %v1409_v50  ;;  %v1447_v24 = vrot.slane %v1409_v50, %v3960_v21 }
  0xf3   : > { %v1443_v38 = vrot.slane %v1426_v48, %v3960_v21  ;;  %v1427_v16 = vcombine.high %v1423_v4, %v1423_v4 }
  0xf5   : > { %v1459_v40 = vrot.slane %v1427_v16, %v3960_v21 }
  0xfa   : > { %v3405_v20 = vpop.f32.mrb[4].mxu0 }
  0xfb   : > { %v996_v22 = vpop.f32.mrb[5].mxu0 }
  0xfc   : > { %v3406_v46 = vpop.f32.mrb[6].mxu0 }
  0xfd   : > { %v999_v23 = vpop.f32.mrb[7].mxu0 }
 0x102   : > { %v3409_v25 = vpop.f32.mrb[8].mxu0 }
 0x103   : > { %v1012_v26 = vpop.f32.mrb[9].mxu0 }
 0x104   : > { %v3410_v35 = vpop.f32.mrb[10].mxu0 }
 0x105   : > { %v1015_v30 = vpop.f32.mrb[11].mxu0 }
 0x10f   : > { %v3441_v49 = vpop.f32.mrb[4].mxu1 }
 0x110   : > { %v3638_v51 = vadd.f32 %v3441_v49, %v3405_v20  ;;  %v1339_v52 = vpop.f32.mrb[5].mxu1  ;;  %v1455_v20 = vrot.slane %v1425_v11, %v3960_v21 }
 0x111   : > { %v3639_v53 = vadd.f32 %v1339_v52, %v996_v22  ;;  %v3442_v56 = vpop.f32.mrb[6].mxu1 }
 0x112   : > { %v1470_v60 = vadd.f32 %v3638_v51, %v1439_v54  ;;  %v3640_v61 = vadd.f32 %v3442_v56, %v3406_v46  ;;  %v1342_v3 = vpop.f32.mrb[7].mxu1 }
 0x113   : > { %v1468_v5 = vadd.f32 %v3639_v53, %v1431_v55  ;;  %v3641_v6 = vadd.f32 %v1342_v3, %v999_v23 }
 0x114   : > { %v1478_v9 = vadd.f32 %v1470_v60, %v498_v34  ;;  %v1471_v10 = vadd.f32 %v3640_v61, %v1443_v38 }
 0x115   : > { %v1476_v12 = vadd.f32 %v1468_v5, %v498_v34  ;;  %v1469_v13 = vadd.f32 %v3641_v6, %v1435_v8 }
 0x116   : > { %v3263_v14 = vmul.f32 -1.442695, %v1478_v9  ;;  %v1479_v17 = vadd.f32 %v1471_v10, %v498_v34 }
 0x117   : > { %v3261_v27 = vmul.f32 -1.442695, %v1476_v12  ;;  %v1477_v47 = vadd.f32 %v1469_v13, %v498_v34  ;;  %v3445_v44 = vpop.f32.mrb[8].mxu1 }
 0x118   : > { %3714 = vpow2.f32 %v3263_v14  ;;  %v3264_v18 = vmul.f32 -1.442695, %v1479_v17  ;;  %v3642_v19 = vadd.f32 %v3445_v44, %v3409_v25  ;;  %v1355_v22 = vpop.f32.mrb[9].mxu1  ;;  %v1451_v25 = vrot.slane %v1423_v4, %v3960_v21 }
 0x119   : > { %3716 = vpow2.f32 %v3261_v27  ;;  %v3262_v46 = vmul.f32 -1.442695, %v1477_v47  ;;  %v3643_v23 = vadd.f32 %v1355_v22, %v1012_v26  ;;  %v3446_v63 = vpop.f32.mrb[10].mxu1 }
 0x11a   : > { %3718 = vpow2.f32 %v3264_v18  ;;  %v1474_v28 = vadd.f32 %v3642_v19, %v1455_v20  ;;  %v3644_v31 = vadd.f32 %v3446_v63, %v3410_v35  ;;  %v1358_v41 = vpop.f32.mrb[11].mxu1 }
 0x11b   : > { %3720 = vpow2.f32 %v3262_v46  ;;  %v1472_v42 = vadd.f32 %v3643_v23, %v1447_v24  ;;  %v3645_v43 = vadd.f32 %v1358_v41, %v1015_v30  ;;  %v499_v24 = vld [vmem:[%s4663_s10 + $0x1] ss:$0 sm:$0xff] }
 0x11c   : > { %v1482_v48 = vadd.f32 %v1474_v28, %v498_v34  ;;  %v1475_v49 = vadd.f32 %v3644_v31, %v1459_v40 }
 0x11d   : > { %v1480_v51 = vadd.f32 %v1472_v42, %v498_v34  ;;  %v1473_v54 = vadd.f32 %v3645_v43, %v1451_v25 }
 0x11e   : > { %v3267_v52 = vmul.f32 -1.442695, %v1482_v48  ;;  %v1483_v26 = vadd.f32 %v1475_v49, %v498_v34 }
 0x11f   : > { %v3265_v53 = vmul.f32 -1.442695, %v1480_v51  ;;  %v1481_v50 = vadd.f32 %v1473_v54, %v498_v34 }
 0x120   : > { %3722 = vpow2.f32 %v3267_v52  ;;  %v3268_v55 = vmul.f32 -1.442695, %v1483_v26 }
 0x121   : > { %3724 = vpow2.f32 %v3265_v53  ;;  %v3266_v35 = vmul.f32 -1.442695, %v1481_v50 }
 0x122   : > { %v3715_v56 = vpop.eup %3714  ;;  %3726 = vpow2.f32 %v3268_v55 }
 0x123   : > { %v3717_v60 = vpop.eup %3716  ;;  %v1510_v61 = vadd.f32 1.0, %v3715_v56  ;;  %3728 = vpow2.f32 %v3266_v35 }
 0x124   : > { %v3719_v30 = vpop.eup %3718  ;;  %v1508_v38 = vadd.f32 1.0, %v3717_v60 }
 0x125   : > { %v3721_v3 = vpop.eup %3720  ;;  %3730 = vrcp.f32 %v1510_v61  ;;  %v1511_v4 = vadd.f32 1.0, %v3719_v30 }
 0x126   : > { %3732 = vrcp.f32 %v1508_v38  ;;  %v1509_v5 = vadd.f32 1.0, %v3721_v3 }
 0x127   : > { %3734 = vrcp.f32 %v1511_v4 }
 0x128   : > { %3736 = vrcp.f32 %v1509_v5 }
 0x12a   : > { %v3723_v6 = vpop.eup %3722 }
 0x12b   : > { %v3725_v34 = vpop.eup %3724  ;;  %v1514_v8 = vadd.f32 1.0, %v3723_v6 }
 0x12c   : > { %v3727_v9 = vpop.eup %3726  ;;  %v1512_v10 = vadd.f32 1.0, %v3725_v34 }
 0x12d   : > { %v3729_v11 = vpop.eup %3728  ;;  %3738 = vrcp.f32 %v1514_v8  ;;  %v1515_v12 = vadd.f32 1.0, %v3727_v9 }
 0x12e   : > { %3740 = vrcp.f32 %v1512_v10  ;;  %v1513_v13 = vadd.f32 1.0, %v3729_v11 }
 0x12f   : > { %v3731_v14 = vpop.eup %3730  ;;  %3742 = vrcp.f32 %v1515_v12 }
 0x130   : > { %v3733_v17 = vpop.eup %3732  ;;  %3744 = vrcp.f32 %v1513_v13 }
 0x131   : > { %v3735_v16 = vpop.eup %3734 }
 0x132   : > { %v3737_v27 = vpop.eup %3736  ;;  %v1533_v47 = vpack.c.bf16 %v3735_v16, %v3731_v14 }
 0x133   : > { %v1532_v44 = vpack.c.bf16 %v3737_v27, %v3733_v17 }
 0x135   : > { %3457 = vmatprep.mubr.msk.bf16.mxu0 %vm1576_vm3, %v1532_v44  ;;  %v500_v44 = vld [vmem:[%s4663_s10 + $0x2] ss:$0 sm:$0xff] }
 0x136   : > { %3458 = vmatmul.mubr.msk.bf16.vlgmr.msra.gmra.mrb[12].mxu0 %vm1576_vm3, %v1533_v47 }
 0x137   : > { %v3739_v18 = vpop.eup %3738 }
 0x138   : > { %v3741_v19 = vpop.eup %3740 }
 0x139   : > { %v3743_v20 = vpop.eup %3742 }
 0x13a   : > { %v3745_v22 = vpop.eup %3744  ;;  %v1535_v46 = vpack.c.bf16 %v3743_v20, %v3739_v18 }
 0x13b   : > { %v1534_v23 = vpack.c.bf16 %v3745_v22, %v3741_v19 }
 0x13d   : > { %3461 = vmatprep.mubr.msk.bf16.mxu0 %vm1576_vm3, %v1534_v23 }
 0x13e   : > { %3462 = vmatmul.mubr.msk.bf16.gmra.mrb[16].mxu0 %vm1576_vm3, %v1535_v46 }
 0x13f   : > { %3467 = vmatprep.mubr.msk.bf16.mxu0 %vm3813_vm1, %v3812_v2 }
 0x209   : > { %v3459_v63 = vpop.f32.mrb[12].mxu0 }
 0x20a   : > { %v1632_v28 = vadd.f32 %v3459_v63, %v499_v24  ;;  %v1623_v31 = vpop.f32.mrb[13].mxu0 }
 0x20b   : > { %v1624_v40 = vadd.f32 %v1623_v31, %v499_v24  ;;  %v3460_v41 = vpop.f32.mrb[14].mxu0 }
 0x20c   : > { %v3280_v42 = vmul.f32 -1.442695, %v1632_v28  ;;  %v1635_v43 = vadd.f32 %v3460_v41, %v499_v24  ;;  %v1626_v25 = vpop.f32.mrb[15].mxu0 }
 0x20d   : > { %v3278_v48 = vmul.f32 -1.442695, %v1624_v40  ;;  %v1627_v49 = vadd.f32 %v1626_v25, %v499_v24 }
 0x20e   : > { %3746 = vpow2.f32 %v3280_v42  ;;  %v3281_v51 = vmul.f32 -1.442695, %v1635_v43 }
 0x20f   : > { %3748 = vpow2.f32 %v3278_v48  ;;  %v3279_v54 = vmul.f32 -1.442695, %v1627_v49 }
 0x210   : > { %3750 = vpow2.f32 %v3281_v51 }
 0x211   : > { %3752 = vpow2.f32 %v3279_v54  ;;  %v3463_v52 = vpop.f32.mrb[16].mxu0 }
 0x212   : > { %v1648_v26 = vadd.f32 %v3463_v52, %v499_v24  ;;  %v1639_v53 = vpop.f32.mrb[17].mxu0 }
 0x213   : > { %v1640_v50 = vadd.f32 %v1639_v53, %v499_v24  ;;  %v3464_v55 = vpop.f32.mrb[18].mxu0 }
 0x214   : > { %v3284_v35 = vmul.f32 -1.442695, %v1648_v26  ;;  %v1651_v56 = vadd.f32 %v3464_v55, %v499_v24  ;;  %v1642_v60 = vpop.f32.mrb[19].mxu0 }
 0x215   : > { %v3282_v61 = vmul.f32 -1.442695, %v1640_v50  ;;  %v1643_v30 = vadd.f32 %v1642_v60, %v499_v24  ;;  %v501_v60 = vld [vmem:[%s4663_s10 + $0x3] ss:$0 sm:$0xff] }
 0x216   : > { %3754 = vpow2.f32 %v3284_v35  ;;  %v3285_v38 = vmul.f32 -1.442695, %v1651_v56  ;;  %v3815_v56 = vmov 0  }
 0x217   : > { %3756 = vpow2.f32 %v3282_v61  ;;  %v3283_v3 = vmul.f32 -1.442695, %v1643_v30  ;;  %3688 = vset.pattern.permute.xlu1 %v3815_v56  ;;  %3687 = vset.pattern.permute.xlu0 %v3815_v56 }
 0x218   : > { %v3747_v4 = vpop.eup %3746  ;;  %3758 = vpow2.f32 %v3285_v38 }
 0x219   : > { %v3749_v5 = vpop.eup %3748  ;;  %v1680_v6 = vadd.f32 1.0, %v3747_v4  ;;  %3760 = vpow2.f32 %v3283_v3 }
 0x21a   : > { %v3751_v34 = vpop.eup %3750  ;;  %v1678_v8 = vadd.f32 1.0, %v3749_v5 }
 0x21b   : > { %v3753_v9 = vpop.eup %3752  ;;  %3762 = vrcp.f32 %v1680_v6  ;;  %v1681_v10 = vadd.f32 1.0, %v3751_v34 }
 0x21c   : > { %3764 = vrcp.f32 %v1678_v8  ;;  %v1679_v11 = vadd.f32 1.0, %v3753_v9 }
 0x21d   : > { %3766 = vrcp.f32 %v1681_v10 }
 0x21e   : > { %3768 = vrcp.f32 %v1679_v11 }
 0x220   : > { %v3755_v12 = vpop.eup %3754 }
 0x221   : > { %v3757_v13 = vpop.eup %3756  ;;  %v1684_v14 = vadd.f32 1.0, %v3755_v12 }
 0x222   : > { %v3759_v17 = vpop.eup %3758  ;;  %v1682_v16 = vadd.f32 1.0, %v3757_v13 }
 0x223   : > { %v3761_v27 = vpop.eup %3760  ;;  %3770 = vrcp.f32 %v1684_v14  ;;  %v1685_v47 = vadd.f32 1.0, %v3759_v17 }
 0x224   : > { %3772 = vrcp.f32 %v1682_v16  ;;  %v1683_v18 = vadd.f32 1.0, %v3761_v27 }
 0x225   : > { %v3763_v19 = vpop.eup %3762  ;;  %3774 = vrcp.f32 %v1685_v47  ;;  %v1777_v47 = vand.u32 127, %v640_v1 }
 0x226   : > { %v3765_v20 = vpop.eup %3764  ;;  %3776 = vrcp.f32 %v1683_v18  ;;  %v1704_v22 = vmul.f32 %v3763_v19, %v500_v44 }
 0x227   : > { %v3767_v46 = vpop.eup %3766  ;;  %v1702_v23 = vmul.f32 %v3765_v20, %v500_v44  ;;  %v1780_v18 = vsub.s32 %v1777_v47, %v3916_v7 }
 0x228   : > { %v3769_v24 = vpop.eup %3768  ;;  %v1717_v63 = vsel %vm1710_vm4, %v1704_v22, 0.0  ;;  %v1705_v28 = vmul.f32 %v3767_v46, %v500_v44 }
 0x229   : > { %1718 = vadd.xlane.f32.xlu1 %v1717_v63  ;;  %v1711_v31 = vsel %vm1710_vm4, %v1702_v23, 0.0  ;;  %v1703_v40 = vmul.f32 %v3769_v24, %v500_v44 }
 0x22a   : > { %1712 = vadd.xlane.f32.xlu0 %v1711_v31  ;;  %v1720_v41 = vsel %vm1710_vm4, %v1705_v28, 0.0 }
 0x22b   : > { %v1714_v43 = vsel %vm1710_vm4, %v1703_v40, 0.0 }
 0x22d   : > { %v3771_v42 = vpop.eup %3770  ;;  %1721 = vadd.xlane.f32.xlu1 %v1720_v41 }
 0x22e   : > { %v3773_v25 = vpop.eup %3772  ;;  %1715 = vadd.xlane.f32.xlu0 %v1714_v43  ;;  %v1708_v26 = vmul.f32 %v3771_v42, %v500_v44 }
 0x22f   : > { %v3775_v48 = vpop.eup %3774  ;;  %v1706_v49 = vmul.f32 %v3773_v25, %v500_v44  ;;  %v497_v25 = vld [vmem:[%s472_s14] sm:$0xff] }
 0x230   : > { %v3777_v51 = vpop.eup %3776  ;;  %v1709_v50 = vmul.f32 %v3775_v48, %v500_v44  ;;  %v1729_v55 = vsel %vm1710_vm4, %v1708_v26, 0.0  ;;  %vm1743_vm12 = vcmp.gt.f32.partialorder %v497_v25, 0.0 }
 0x231   : > { %v1723_v54 = vsel %vm1710_vm4, %v1706_v49, 0.0  ;;  %v1707_v52 = vmul.f32 %v3777_v51, %v500_v44 }
 0x232   : > { %1724 = vadd.xlane.f32.xlu0 %v1723_v54  ;;  %v1732_v35 = vsel %vm1710_vm4, %v1709_v50, 0.0 }
 0x233   : > { %v1726_v53 = vsel %vm1710_vm4, %v1707_v52, 0.0  ;;  %vm2734_vm4 = vcmask 588800  }
 0x234   : > { %1727 = vadd.xlane.f32.xlu1 %v1726_v53 }
 0x236   : > { %1730 = vadd.xlane.f32.xlu0 %v1729_v55 }
 0x238   : > { %1733 = vadd.xlane.f32.xlu1 %v1732_v35 }
 0x2b6   : > { %v1719_v61 = vpop.xlane.xlu1 %1718 }
 0x2b7   : > { %v1737_v30 = vadd.f32 %v1719_v61, %v501_v60  ;;  %v1713_v38 = vpop.xlane.xlu0 %1712 }
 0x2b8   : > { %v1735_v3 = vadd.f32 %v1713_v38, %v501_v60  ;;  %v2055_v38 = vsel %vm1915_vm14, %v4000_v37, 0 }
 0x2b9   : > { %1759 = vperm.xlu1 %3688, %v1737_v30   ;;  %v1917_v30 = vsel %vm1915_vm14, %v3986_v32, 0  ;;  %3484 = vmatpush3.bf16.msra.mxu1 %v2055_v38 }
 0x2ba   : > { %v1722_v4 = vpop.xlane.xlu1 %1721  ;;  %1753 = vperm.xlu0 %3687, %v1735_v3   ;;  %3466 = vmatpush3.bf16.msra.mxu0 %v1917_v30 }
 0x2bb   : > { %v1738_v5 = vadd.f32 %v1722_v4, %v501_v60  ;;  %v1716_v6 = vpop.xlane.xlu0 %1715  ;;  %3471 = vmatprep.subr.bf16.mxu0 %v3812_v2  ;;  %3495 = vmatprep.subr.bf16.mxu1 %v3812_v2 }
 0x2bc   : > { %v1736_v34 = vadd.f32 %v1716_v6, %v501_v60 }
 0x2bd   : > { %1762 = vperm.xlu1 %3688, %v1738_v5  }
 0x2bf   : > { %v1725_v8 = vpop.xlane.xlu0 %1724 }
 0x2c0   : > { %v1739_v12 = vadd.f32 %v1725_v8, %v501_v60 }
 0x2c1   : > { %1756 = vperm.xlu1 %3688, %v1736_v34   ;;  %v1728_v11 = vpop.xlane.xlu1 %1727 }
 0x2c2   : > { %v1740_v13 = vadd.f32 %v1728_v11, %v501_v60 }
 0x2c3   : > { %v1731_v9 = vpop.xlane.xlu0 %1730 }
 0x2c4   : > { %v1741_v10 = vadd.f32 %v1731_v9, %v501_v60 }
 0x2c5   : > { %v1734_v14 = vpop.xlane.xlu1 %1733 }
 0x2c6   : > { %1771 = vperm.xlu1 %3688, %v1741_v10   ;;  %v1742_v17 = vadd.f32 %v1734_v14, %v501_v60 }
 0x2ca   : > { %1765 = vperm.xlu1 %3688, %v1739_v12   ;;  %v1963_v12 = vsel %vm1915_vm14, %v3989_v33, 0 }
 0x2ce   : > { %1768 = vperm.xlu1 %3688, %v1740_v13  }
 0x2d2   : > { %1774 = vperm.xlu1 %3688, %v1742_v17  }
 0x338   : > { %v1760_v16 = vpop.permute.xlu1 %1759 }
 0x339   : > { %v1754_v19 = vpop.permute.xlu0 %1753  ;;  %v1789_v24 = vrot.slane %v1760_v16, %v1780_v18 }
 0x33a   : > { %v1781_v46 = vrot.slane %v1754_v19, %v1780_v18 }
 0x33c   : > { %v1763_v27 = vpop.permute.xlu1 %1762 }
 0x33d   : > { %v1793_v40 = vrot.slane %v1763_v27, %v1780_v18  ;;  %v2147_v27 = vsel %vm1915_vm14, %v4006_v39, 0 }
 0x340   : > { %v1757_v44 = vpop.permute.xlu1 %1756 }
 0x341   : > { %v1785_v20 = vrot.slane %v1757_v44, %v1780_v18 }
 0x343   : > { %v1811_v23 = vsel %vm1810_vm5, %v1785_v20, %v1781_v46  ;;  %v2239_v46 = vsel %vm1915_vm14, %v4021_v45, 0 }
 0x344   : > { %v1813_v28 = vsel %vm1812_vm6, %v1789_v24, %v1811_v23 }
 0x345   : > { %v1772_v22 = vpop.permute.xlu1 %1771  ;;  %v1815_v41 = vsel %vm1814_vm7, %v1793_v40, %v1813_v28  ;;  %v3799_v28 = vld [vmem:[%s3977_s12 + $0x10] sm:$0xf] }
 0x346   : > { %v1805_v49 = vrot.slane %v1772_v22, %v1780_v18 }
 0x349   : > { %v1766_v63 = vpop.permute.xlu1 %1765 }
 0x34a   : > { %v1797_v31 = vrot.slane %v1766_v63, %v1780_v18 }
 0x34c   : > { %v1817_v43 = vsel %vm1816_vm8, %v1797_v31, %v1815_v41  ;;  %v2101_v31 = vsel %vm1915_vm14, %v3799_v28, 0  ;;  %v2325_v41 = vsel %vm1915_vm14, %v4041_v59, 0  ;;  %v2411_v59 = vsel %vm1915_vm14, %v4073_v36, 0 }
 0x34d   : > { %v1769_v1 = vpop.permute.xlu1 %1768  ;;  %v2497_v36 = vsel %vm1915_vm14, %v4091_v58, 0  ;;  %v2583_v58 = vsel %vm1915_vm14, %v4102_v0, 0  ;;  %v2540_v0 = vsel %vm1915_vm14, %v4099_v62, 0 }
 0x34e   : > { %v1801_v42 = vrot.slane %v1769_v1, %v1780_v18 }
 0x350   : > { %v1819_v48 = vsel %vm1818_vm9, %v1801_v42, %v1817_v43  ;;  %v3800_v43 = vld [vmem:[%s3977_s12 + $0x18] sm:$0xf] }
 0x351   : > { %v1775_v51 = vpop.permute.xlu1 %1774  ;;  %v1821_v52 = vsel %vm1820_vm10, %v1805_v49, %v1819_v48  ;;  %v2193_v25 = vsel %vm1915_vm14, %v3800_v43, 0 }
 0x352   : > { %v1809_v54 = vrot.slane %v1775_v51, %v1780_v18  ;;  %v3798_v18 = vld [vmem:[%s3977_s12 + $0x8] sm:$0xf]  ;;  %s3816_s12 = smov 36  }
 0x353   : > { %v2009_v19 = vsel %vm1915_vm14, %v3798_v18, 0 }
 0x354   : > { %v1823_v26 = vsel %vm1822_vm11, %v1809_v54, %v1821_v52  ;;  %v3801_v54 = vld [vmem:[%s4012_s21] sm:$0xf]  ;;  %s3817_s21 = smov 18  }
 0x355   : > { %v1825_v53 = vsel %vm1743_vm12, %v1823_v26, -4.2949673e+09  ;;  %v2282_v52 = vsel %vm1915_vm14, %v3801_v54, 0  ;;  %v2368_v26 = vsel %vm1915_vm14, %v4070_v29, 0  ;;  %v2454_v29 = vsel %vm1915_vm14, %v4088_v57, 0  ;;  %v4343_v57 = vld [vmem:[%s3935_s19] sm:$0xff]  ;;  %v2749_v54 = vld [vmem:[%s4661_s8 + $0x28] sm:$0xff] }
 0x356   : > { %v1827_v50 = vsel %vm1826_vm13, %v1825_v53, -inf }
 0x357   : > { %1828 = vmax.xlane.f32.xlu1 %v1827_v50 }
 0x368   : > { %2678 = vrot.lane.b32.xlu1 %v4343_v57, %s3816_s12  ;;  %s3819_s12 = smov 90  }
 0x3e4   : > { %v1829_v55 = vpop.xlane.xlu1 %1828 }
 0x3e5   : > { %v1830_v35 = vsub.f32 %v1825_v53, %v1829_v55  ;;  %v4347_v53 = vld [vmem:[%s3945_s22] sm:$0xff] }
 0x3e7   : > { %v1831_v56 = vmul.f32 1.442695, %v1830_v35 }
 0x3e9   : > { %3778 = vpow2.f32 %v1831_v56 }
 0x3f3   : > { %v3779_v60 = vpop.eup %3778 }
 0x3f4   : > { %v1833_v61 = vsel %vm1826_vm13, %v3779_v60, 0.0 }
 0x3f5   : > { %1834 = vadd.xlane.f32.xlu0 %v1833_v61 }
 0x40b   : > { %2674 = vrot.lane.b32.xlu0 %v4347_v53, %s3817_s21 }
 0x482   : > { %v1835_v3 = vpop.xlane.xlu0 %1834 }
 0x483   : > { %3780 = vrcp.f32 %v1835_v3 }
 0x48d   : > { %v3781_v4 = vpop.eup %3780 }
 0x48e   : > { %v1837_v5 = vmul.f32 %v3781_v4, %v3779_v60 }
 0x490   : > { %v1839_v6 = vcombine.high %v1837_v5, %v1837_v5  ;;  %v1846_v34 = vrot.slane %v1837_v5, %v3939_v15 }
 0x492   : > { %v1853_v8 = vrot.slane %v1839_v6, %v3939_v15  ;;  %v1854_v9 = vcombine.high %v1846_v34, %v1846_v34  ;;  %v1862_v32 = vrot.slane %v1846_v34, %v3939_v15 }
 0x494   : > { %v1876_v10 = vrot.slane %v1854_v9, %v3939_v15  ;;  %v1896_v11 = vsel %vm537_vm0, %v1862_v32, 1.0  ;;  %v1855_v14 = vcombine.high %v1853_v8, %v1853_v8  ;;  %v1884_v20 = vcombine.high %v1862_v32, %v1862_v32 }
 0x495   : > { %v4241_v37 = vpack.c.bf16 %v1896_v11, %v1896_v11  ;;  %v1869_v45 = vrot.slane %v1853_v8, %v3939_v15 }
 0x496   : > { %v1886_v13 = vcombine.high %v1876_v10, %v1876_v10  ;;  %v1897_v33 = vsel %vm537_vm0, %v1876_v10, 1.0  ;;  %v1883_v47 = vrot.slane %v1855_v14, %v3939_v15  ;;  %v1898_v23 = vsel %vm537_vm0, %v1884_v20, 1.0 }
 0x497   : > { %3468 = vmatmul.mubr.msk.bf16.vlgmr.msra.gmra.mrb[20].mxu0 %vm1826_vm13, %v4241_v37  ;;  %v1905_v44 = vpack.c.bf16 %v1897_v33, %v1897_v33  ;;  %v1906_v63 = vpack.c.bf16 %v1898_v23, %v1898_v23  ;;  %v1900_v42 = vsel %vm537_vm0, %v1869_v45, 1.0  ;;  %v1885_v48 = vcombine.high %v1869_v45, %v1869_v45  ;;  %v2746_v45 = vld [vmem:[%s4661_s8 + $0x10] sm:$0xff] }
 0x498   : > { %3472 = vmatpush3.bf16.msra.mxu0 %v1963_v12  ;;  %v1899_v17 = vsel %vm537_vm0, %v1886_v13, 1.0  ;;  %3473 = vmatprep.mubr.msk.bf16.mxu0 %vm3813_vm1, %v3812_v2  ;;  %v1901_v39 = vsel %vm537_vm0, %v1883_v47, 1.0  ;;  %v1887_v24 = vcombine.high %v1883_v47, %v1883_v47  ;;  %v1908_v15 = vpack.c.bf16 %v1900_v42, %v1900_v42 }
 0x499   : > { %v4250_v16 = vpack.c.bf16 %v1899_v17, %v1899_v17  ;;  %3477 = vmatprep.subr.bf16.mxu0 %v3812_v2  ;;  %v1909_v22 = vpack.c.bf16 %v1901_v39, %v1901_v39  ;;  %v1902_v49 = vsel %vm537_vm0, %v1885_v48, 1.0 }
 0x49a   : > { %v1903_v40 = vsel %vm537_vm0, %v1887_v24, 1.0  ;;  %v1910_v51 = vpack.c.bf16 %v1902_v49, %v1902_v49  ;;  %v2745_v24 = vld [vmem:[%s4661_s8 + $0x8] sm:$0xff]  ;;  %vm2730_vm0 = vcmask 293888  }
 0x49b   : > { %3486 = vmatmul.mubr.msk.bf16.vlgmr.msra.gmra.mrb[12].mxu1 %vm1826_vm13, %v4250_v16  ;;  %v1911_v1 = vpack.c.bf16 %v1903_v40, %v1903_v40  ;;  %v2744_v40 = vld [vmem:[%s4661_s8] sm:$0xff] }
 0x49c   : > { %3496 = vmatpush3.bf16.msra.mxu1 %v2147_v27  ;;  %3497 = vmatprep.mubr.msk.bf16.mxu1 %vm3813_vm1, %v3812_v2 }
 0x49d   : > { %3507 = vmatprep.subr.bf16.mxu1 %v3812_v2 }
 0x49f   : > { %3474 = vmatmul.mubr.msk.bf16.vlgmr.msra.gmra.mrb[24].mxu0 %vm1826_vm13, %v1905_v44 }
 0x4a0   : > { %3478 = vmatpush3.bf16.msra.mxu0 %v2009_v19  ;;  %3479 = vmatprep.mubr.msk.bf16.mxu0 %vm3813_vm1, %v3812_v2 }
 0x4a1   : > { %3489 = vmatprep.subr.bf16.mxu0 %v3812_v2 }
 0x4a3   : > { %3498 = vmatmul.mubr.msk.bf16.vlgmr.msra.gmra.mrb[16].mxu1 %vm1826_vm13, %v1909_v22 }
 0x4a4   : > { %3508 = vmatpush3.bf16.msra.mxu1 %v2239_v46  ;;  %3509 = vmatprep.mubr.msk.bf16.mxu1 %vm3813_vm1, %v3812_v2 }
 0x4a5   : > { %3519 = vmatprep.subr.bf16.mxu1 %v3812_v2 }
 0x4a7   : > { %3480 = vmatmul.mubr.msk.bf16.vlgmr.msra.gmra.mrb[28].mxu0 %vm1826_vm13, %v1906_v63 }
 0x4a8   : > { %3490 = vmatpush3.bf16.msra.mxu0 %v2101_v31  ;;  %3491 = vmatprep.mubr.msk.bf16.mxu0 %vm3813_vm1, %v3812_v2 }
 0x4a9   : > { %3501 = vmatprep.subr.bf16.mxu0 %v3812_v2 }
 0x4ab   : > { %3510 = vmatmul.mubr.msk.bf16.vlgmr.msra.gmra.mrb[20].mxu1 %vm1826_vm13, %v1911_v1 }
 0x4ac   : > { %3520 = vmatpush3.bf16.msra.mxu1 %v2325_v41  ;;  %3521 = vmatprep.mubr.msk.bf16.mxu1 %vm3813_vm1, %v3812_v2 }
 0x4ad   : > { %3531 = vmatprep.subr.bf16.mxu1 %v3812_v2 }
 0x4af   : > { %3492 = vmatmul.mubr.msk.bf16.vlgmr.msra.gmra.mrb[32].mxu0 %vm1826_vm13, %v1908_v15 }
 0x4b0   : > { %3502 = vmatpush3.bf16.msra.mxu0 %v2193_v25  ;;  %3503 = vmatprep.mubr.msk.bf16.mxu0 %vm3813_vm1, %v3812_v2 }
 0x4b1   : > { %3513 = vmatprep.subr.bf16.mxu0 %v3812_v2 }
 0x4b3   : > { %3522 = vmatmul.mubr.msk.bf16.vlgmr.msra.gmra.mrb[24].mxu1 %vm1826_vm13, %v1905_v44 }
 0x4b4   : > { %3532 = vmatpush3.bf16.msra.mxu1 %v2411_v59  ;;  %3533 = vmatprep.mubr.msk.bf16.mxu1 %vm3813_vm1, %v3812_v2 }
 0x4b5   : > { %3543 = vmatprep.subr.bf16.mxu1 %v3812_v2 }
 0x4b7   : > { %3504 = vmatmul.mubr.msk.bf16.vlgmr.msra.gmra.mrb[36].mxu0 %vm1826_vm13, %v1910_v51 }
 0x4b8   : > { %3514 = vmatpush3.bf16.msra.mxu0 %v2282_v52  ;;  %3515 = vmatprep.mubr.msk.bf16.mxu0 %vm3813_vm1, %v3812_v2  ;;  %v2751_v52 = vld [vmem:[%s4661_s8 + $0x38] sm:$0xff] }
 0x4b9   : > { %3525 = vmatprep.subr.bf16.mxu0 %v3812_v2 }
 0x4bb   : > { %3534 = vmatmul.mubr.msk.bf16.vlgmr.msra.gmra.mrb[28].mxu1 %vm1826_vm13, %v4250_v16 }
 0x4bc   : > { %3544 = vmatpush3.bf16.msra.mxu1 %v2497_v36  ;;  %3545 = vmatprep.mubr.msk.bf16.mxu1 %vm3813_vm1, %v3812_v2  ;;  %v2748_v36 = vld [vmem:[%s4661_s8 + $0x20] sm:$0xff] }
 0x4bd   : > { %3555 = vmatprep.subr.bf16.mxu1 %v3812_v2 }
 0x4bf   : > { %3516 = vmatmul.mubr.msk.bf16.vlgmr.msra.gmra.mrb[40].mxu0 %vm1826_vm13, %v4241_v37 }
 0x4c0   : > { %3526 = vmatpush3.bf16.msra.mxu0 %v2368_v26  ;;  %3527 = vmatprep.mubr.msk.bf16.mxu0 %vm3813_vm1, %v3812_v2 }
 0x4c1   : > { %3537 = vmatprep.subr.bf16.mxu0 %v3812_v2 }
 0x4c3   : > { %3546 = vmatmul.mubr.msk.bf16.vlgmr.msra.gmra.mrb[32].mxu1 %vm1826_vm13, %v1909_v22 }
 0x4c4   : > { %3556 = vmatpush3.bf16.msra.mxu1 %v2583_v58  ;;  %3557 = vmatprep.mubr.msk.bf16.mxu1 %vm3813_vm1, %v3812_v2 }
 0x4c7   : > { %3528 = vmatmul.mubr.msk.bf16.vlgmr.msra.gmra.mrb[44].mxu0 %vm1826_vm13, %v1906_v63  ;;  %v2747_v63 = vld [vmem:[%s4661_s8 + $0x18] sm:$0xff] }
 0x4c8   : > { %3538 = vmatpush3.bf16.msra.mxu0 %v2454_v29  ;;  %3539 = vmatprep.mubr.msk.bf16.mxu0 %vm3813_vm1, %v3812_v2  ;;  %v3561_v31 = vpack.c.bf16 %v2747_v63, %v2745_v24  ;;  %v2765_v24 = vld [vmem:[%s4661_s8 + $0xa8] sm:$0xff]  ;;  %v2767_v63 = vld [vmem:[%s4661_s8 + $0xb8] sm:$0xff] }
 0x4c9   : > { %3549 = vmatprep.subr.bf16.mxu0 %v3812_v2 }
 0x4cb   : > { %3558 = vmatmul.mubr.msk.bf16.vlgmr.msra.gmra.mrb[36].mxu1 %vm1826_vm13, %v1911_v1 }
 0x4cf   : > { %3540 = vmatmul.mubr.msk.bf16.vlgmr.msra.gmra.mrb[48].mxu0 %vm1826_vm13, %v1908_v15  ;;  %v3563_v15 = vpack.c.bf16 %v2746_v45, %v2744_v40 }
 0x4d0   : > { %3550 = vmatpush3.bf16.msra.mxu0 %v2540_v0  ;;  %3551 = vmatprep.mubr.msk.bf16.mxu0 %vm3813_vm1, %v3812_v2  ;;  %v3565_v0 = vpack.c.bf16 %v2751_v52, %v2749_v54  ;;  %vm2732_vm1 = vcmask 441344  }
 0x4d1   : > { %3562 = vmatprep.subr.bf16.mxu0 %v3561_v31 }
 0x4d7   : > { %3552 = vmatmul.mubr.msk.bf16.vlgmr.msra.gmra.mrb[52].mxu0 %vm1826_vm13, %v1910_v51 }
 0x4d8   : > { %3564 = vmatpush1.bf16.msra.mxu0 %v3563_v15  ;;  %v2764_v15 = vld [vmem:[%s4661_s8 + $0xa0] sm:$0xff] }
 0x4d9   : > { %3566 = vmatprep.subr.bf16.mxu0 %v3565_v0  ;;  %v2768_v0 = vld [vmem:[%s4661_s8 + $0xc0] sm:$0xff] }
 0x56a   : > { %v1953_v50 = vpop.f32.mrb[20].mxu0 }
 0x56b   : > { %v3469_v62 = vpop.f32.mrb[21].mxu0  ;;  %v2633_v30 = vrot.slane %v1953_v50, 1 }
 0x56c   : > { %v1956_v55 = vpop.f32.mrb[22].mxu0 }
 0x56d   : > { %v3470_v35 = vpop.f32.mrb[23].mxu0 }
 0x56e   : > { %v2091_v56 = vpop.f32.mrb[12].mxu1 }
 0x56f   : > { %v3487_v60 = vpop.f32.mrb[13].mxu1  ;;  %v2637_v16 = vrot.slane %v2091_v56, 6  ;;  %v2699_v27 = vrot.slane %v2091_v56, 5 }
 0x570   : > { %v2094_v61 = vpop.f32.mrb[14].mxu1  ;;  %v2753_v60 = vld [vmem:[%s4661_s8 + $0x48] sm:$0xff] }
 0x571   : > { %v3488_v38 = vpop.f32.mrb[15].mxu1  ;;  %v2755_v61 = vld [vmem:[%s4661_s8 + $0x58] sm:$0xff] }
 0x572   : > { %v1999_v3 = vpop.f32.mrb[24].mxu0 }
 0x573   : > { %v2634_v4 = vsel %vm1810_vm5, %v1999_v3, %v2633_v30  ;;  %v2695_v5 = vrot.slane %v1999_v3, 7  ;;  %v3475_v6 = vpop.f32.mrb[25].mxu0  ;;  %v2752_v30 = vld [vmem:[%s4661_s8 + $0x40] sm:$0xff]  ;;  %v3569_v3 = vpack.c.bf16 %v2755_v61, %v2753_v60 }
 0x574   : > { %v2002_v34 = vpop.f32.mrb[26].mxu0  ;;  %v2759_v6 = vld [vmem:[%s4661_s8 + $0x78] sm:$0xff] }
 0x575   : > { %v2696_v8 = vsel %vm1810_vm5, %v2695_v5, %v1953_v50  ;;  %v3476_v9 = vpop.f32.mrb[27].mxu0  ;;  %v2750_v50 = vld [vmem:[%s4661_s8 + $0x30] sm:$0xff]  ;;  %v2757_v5 = vld [vmem:[%s4661_s8 + $0x68] sm:$0xff] }
 0x576   : > { %v2183_v32 = vpop.f32.mrb[16].mxu1  ;;  %v3567_v55 = vpack.c.bf16 %v2750_v50, %v2748_v36  ;;  %v2770_v50 = vld [vmem:[%s4661_s8 + $0xd0] sm:$0xff] }
 0x577   : > { %v3499_v10 = vpop.f32.mrb[17].mxu1  ;;  %v2641_v43 = vrot.slane %v2183_v32, 4  ;;  %v2703_v25 = vrot.slane %v2183_v32, 3  ;;  %v3587_v60 = vpack.c.bf16 %v2770_v50, %v2768_v0  ;;  %v2936_v50 = vld [vmem:[%s4662_s9] sm:$0xff] }
 0x578   : > { %v2186_v11 = vpop.f32.mrb[18].mxu1  ;;  %3568 = vmatpush1.bf16.msra.mxu0 %v3567_v55  ;;  %v3573_v10 = vpack.c.bf16 %v2759_v6, %v2757_v5  ;;  %v2775_v55 = vld [vmem:[%s4661_s8 + $0xf8] sm:$0xff] }
 0x579   : > { %v3500_v37 = vpop.f32.mrb[19].mxu1  ;;  %v2756_v11 = vld [vmem:[%s4661_s8 + $0x60] sm:$0xff]  ;;  %3570 = vmatprep.subr.bf16.mxu0 %v3569_v3  ;;  %v2774_v3 = vld [vmem:[%s4661_s8 + $0xf0] sm:$0xff] }
 0x57a   : > { %v2045_v12 = vpop.f32.mrb[28].mxu0  ;;  %v2758_v37 = vld [vmem:[%s4661_s8 + $0x70] sm:$0xff] }
 0x57b   : > { %v2635_v13 = vrot.slane %v2045_v12, 7  ;;  %v2697_v14 = vrot.slane %v2045_v12, 6  ;;  %v3481_v17 = vpop.f32.mrb[29].mxu0  ;;  %v2761_v12 = vld [vmem:[%s4661_s8 + $0x88] sm:$0xff] }
 0x57c   : > { %v2048_v33 = vpop.f32.mrb[30].mxu0 }
 0x57d   : > { %v2636_v47 = vsel %vm1812_vm6, %v2635_v13, %v2634_v4  ;;  %v2698_v44 = vsel %vm1812_vm6, %v2697_v14, %v2696_v8  ;;  %v3482_v18 = vpop.f32.mrb[31].mxu0  ;;  %v2754_v4 = vld [vmem:[%s4661_s8 + $0x50] sm:$0xff] }
 0x57e   : > { %v4354_v19 = vpop.f32.mrb[20].mxu1  ;;  %v2638_v39 = vsel %vm1814_vm7, %v2637_v16, %v2636_v47  ;;  %v2700_v20 = vsel %vm1814_vm7, %v2699_v27, %v2698_v44  ;;  %v3571_v32 = vpack.c.bf16 %v2754_v4, %v2752_v30  ;;  %v2763_v16 = vld [vmem:[%s4661_s8 + $0x98] sm:$0xff]  ;;  %v3575_v44 = vpack.c.bf16 %v2758_v37, %v2756_v11 }
 0x57f   : > { %v3511_v22 = vpop.f32.mrb[21].mxu1  ;;  %v2645_v13 = vrot.slane %v4354_v19, 2  ;;  %v2707_v14 = vrot.slane %v4354_v19, 1  ;;  %v3577_v19 = vpack.c.bf16 %v2763_v16, %v2761_v12 }
 0x580   : > { %v2278_v46 = vpop.f32.mrb[22].mxu1  ;;  %3572 = vmatpush1.bf16.msra.mxu0 %v3571_v32  ;;  %v2760_v22 = vld [vmem:[%s4661_s8 + $0x80] sm:$0xff] }
 0x581   : > { %v3512_v23 = vpop.f32.mrb[23].mxu1  ;;  %3574 = vmatprep.subr.bf16.mxu0 %v3573_v10  ;;  %v2762_v46 = vld [vmem:[%s4661_s8 + $0x90] sm:$0xff] }
 0x582   : > { %v2137_v28 = vpop.f32.mrb[32].mxu0 }
 0x583   : > { %v2639_v1 = vrot.slane %v2137_v28, 5  ;;  %v2701_v41 = vrot.slane %v2137_v28, 4  ;;  %v3493_v42 = vpop.f32.mrb[33].mxu0 }
 0x584   : > { %v2140_v48 = vpop.f32.mrb[34].mxu0  ;;  %3576 = vmatpush1.bf16.msra.mxu0 %v3575_v44  ;;  %v3581_v42 = vpack.c.bf16 %v2767_v63, %v2765_v24 }
 0x585   : > { %v2640_v59 = vsel %vm1816_vm8, %v2639_v1, %v2638_v39  ;;  %v2702_v49 = vsel %vm1816_vm8, %v2701_v41, %v2700_v20  ;;  %v3494_v51 = vpop.f32.mrb[35].mxu0  ;;  %v3579_v1 = vpack.c.bf16 %v2762_v46, %v2760_v22  ;;  %3578 = vmatprep.subr.bf16.mxu0 %v3577_v19 }
 0x586   : > { %v4381_v26 = vpop.f32.mrb[24].mxu1  ;;  %v2642_v58 = vsel %vm1818_vm9, %v2641_v43, %v2640_v59  ;;  %v2704_v29 = vsel %vm1818_vm9, %v2703_v25, %v2702_v49  ;;  %v2766_v43 = vld [vmem:[%s4661_s8 + $0xb0] sm:$0xff]  ;;  %v2771_v49 = vld [vmem:[%s4661_s8 + $0xd8] sm:$0xff] }
 0x587   : > { %v3523_v62 = vpop.f32.mrb[25].mxu1  ;;  %v2712_v31 = vrot.slane %v4381_v26, 7  ;;  %v3583_v36 = vpack.c.bf16 %v2766_v43, %v2764_v15 }
 0x588   : > { %v2364_v35 = vpop.f32.mrb[26].mxu1  ;;  %3580 = vmatpush1.bf16.msra.mxu0 %v3579_v1  ;;  %v2781_v1 = vld [vmem:[%s4661_s8 + $0x128] sm:$0xff] }
 0x589   : > { %v3524_v56 = vpop.f32.mrb[27].mxu1  ;;  %3582 = vmatprep.subr.bf16.mxu0 %v3581_v42 }
 0x58a   : > { %v2229_v38 = vpop.f32.mrb[36].mxu0 }
 0x58b   : > { %v2643_v34 = vrot.slane %v2229_v38, 3  ;;  %v2705_v8 = vrot.slane %v2229_v38, 2  ;;  %v3505_v9 = vpop.f32.mrb[37].mxu0  ;;  %v2772_v38 = vld [vmem:[%s4661_s8 + $0xe0] sm:$0xff] }
 0x58c   : > { %v2232_v17 = vpop.f32.mrb[38].mxu0  ;;  %3584 = vmatpush1.bf16.msra.mxu0 %v3583_v36  ;;  %v3591_v37 = vpack.c.bf16 %v2774_v3, %v2772_v38 }
 0x58d   : > { %v3506_v27 = vpop.f32.mrb[39].mxu0  ;;  %v2644_v33 = vsel %vm1820_vm10, %v2643_v34, %v2642_v58  ;;  %v2706_v47 = vsel %vm1820_vm10, %v2705_v8, %v2704_v29 }
 0x58e   : > { %v4422_v18 = vpop.f32.mrb[28].mxu1  ;;  %v2646_v39 = vsel %vm1822_vm11, %v2645_v13, %v2644_v33  ;;  %v2708_v20 = vsel %vm1822_vm11, %v2707_v14, %v2706_v47  ;;  %v2777_v33 = vld [vmem:[%s4661_s8 + $0x108] sm:$0xff]  ;;  %v2779_v47 = vld [vmem:[%s4661_s8 + $0x118] sm:$0xff] }
 0x58f   : > { %2681 = vrot.lane.b32.xlu1 %v2646_v39, %s3818_s25  ;;  %v3535_v23 = vpop.f32.mrb[29].mxu1  ;;  %v2648_v40 = vmul.f32 %v4347_v53, %v2646_v39  ;;  %v2769_v53 = vld [vmem:[%s4661_s8 + $0xc8] sm:$0xff]  ;;  %v2661_v34 = vrot.slane %v4422_v18, 6  ;;  %v2716_v8 = vrot.slane %v4422_v18, 5  ;;  %v3593_v18 = vpack.c.bf16 %v2779_v47, %v2777_v33  ;;  %v2776_v39 = vld [vmem:[%s4661_s8 + $0x100] sm:$0xff] }
 0x590   : > { %v2450_v28 = vpop.f32.mrb[30].mxu1  ;;  %v3585_v29 = vpack.c.bf16 %v2771_v49, %v2769_v53  ;;  %v2785_v49 = vld [vmem:[%s4661_s8 + $0x148] sm:$0x3] }
 0x591   : > { %v3536_v45 = vpop.f32.mrb[31].mxu1 }
 0x592   : > { %v2318_v41 = vpop.f32.mrb[40].mxu0  ;;  %3586 = vmatprep.subr.bf16.mxu0 %v3585_v29 }
 0x593   : > { %v2657_v25 = vrot.slane %v2318_v41, 1  ;;  %v2713_v48 = vsel %vm1810_vm5, %v2712_v31, %v2318_v41  ;;  %v3517_v59 = vpop.f32.mrb[41].mxu0  ;;  %2688 = vrot.lane.b32.xlu1 %v2648_v40, %s3819_s12  ;;  %3588 = vmatpush1.bf16.msra.mxu0 %v3587_v60  ;;  %v2783_v41 = vld [vmem:[%s4661_s8 + $0x138] sm:$0xff]  ;;  %v3821_v60 = vmov 0.0|0.0   ;;  %s448_s12 = scalar_lea.vmem %s4653_s0, %s3928_s13 }
 0x594   : > { %v2321_v51 = vpop.f32.mrb[42].mxu0  ;;  %v3597_v43 = vpack.c.bf16 %v2783_v41, %v2781_v1  ;;  %3601 = vmatprep.subr.bf16.mxu1 %v3821_v60  ;;  %v2950_v41 = vld [vmem:[%s4662_s9 + $0x70] sm:$0xff] }
 0x595   : > { %v2658_v54 = vsel %vm1810_vm5, %v4381_v26, %v2657_v25  ;;  %v3518_v52 = vpop.f32.mrb[43].mxu0  ;;  %v2773_v26 = vld [vmem:[%s4661_s8 + $0xe8] sm:$0xff]  ;;  %v2780_v25 = vld [vmem:[%s4661_s8 + $0x120] sm:$0xff]  ;;  %vm2736_vm5 = vcmask 736256  }
 0x596   : > { %v2533_v58 = vpop.f32.mrb[32].mxu1  ;;  %v3589_v30 = vpack.c.bf16 %v2775_v55, %v2773_v26  ;;  %v2784_v51 = vld [vmem:[%s4661_s8 + $0x140] sm:$0x3]  ;;  %v2938_v26 = vld [vmem:[%s4662_s9 + $0x10] sm:$0xff] }
 0x597   : > { %2709 = vrot.lane.b32.xlu1 %v2708_v20, %s3820_s26  ;;  %v3547_v62 = vpop.f32.mrb[33].mxu1  ;;  %v2778_v20 = vld [vmem:[%s4661_s8 + $0x110] sm:$0xff]  ;;  %v2665_v24 = vrot.slane %v2533_v58, 4  ;;  %v2720_v63 = vrot.slane %v2533_v58, 3 }
 0x598   : > { %v2536_v35 = vpop.f32.mrb[34].mxu1  ;;  %3590 = vmatprep.subr.bf16.mxu0 %v3589_v30  ;;  %v3595_v23 = vpack.c.bf16 %v2778_v20, %v2776_v39  ;;  %v2937_v62 = vld [vmem:[%s4662_s9 + $0x8] sm:$0xff]  ;;  %v2939_v30 = vld [vmem:[%s4662_s9 + $0x18] sm:$0xff]  ;;  %v2942_v20 = vld [vmem:[%s4662_s9 + $0x30] sm:$0xff] }
 0x599   : > { %v3548_v56 = vpop.f32.mrb[35].mxu1  ;;  %3592 = vmatpush1.bf16.msra.mxu0 %v3591_v37 }
 0x59a   : > { %v2404_v61 = vpop.f32.mrb[44].mxu0  ;;  %3594 = vmatprep.subr.bf16.mxu0 %v3593_v18  ;;  %v2941_v18 = vld [vmem:[%s4662_s9 + $0x28] sm:$0xff] }
 0x59b   : > { %v2659_v4 = vrot.slane %v2404_v61, 7  ;;  %v2714_v5 = vrot.slane %v2404_v61, 6  ;;  %v3529_v6 = vpop.f32.mrb[45].mxu0  ;;  %v3602_v61 = vpack.c.bf16 %v2937_v62, %v2936_v50  ;;  %v3188_v50 = vld [vmem:[%s4663_s10 + $0x4] ss:$8 sm:$0x3] }
 0x59c   : > { %v2407_v9 = vpop.f32.mrb[46].mxu0  ;;  %v2679_v6 = vpop.permute.xlu1 %2678  ;;  %v2793_v62 = vsub.s32 1, %v3916_v7 }
 0x59d   : > { %v2660_v32 = vsel %vm1812_vm6, %v2659_v4, %v2658_v54  ;;  %v2715_v10 = vsel %vm1812_vm6, %v2714_v5, %v2713_v48  ;;  %v3530_v11 = vpop.f32.mrb[47].mxu0  ;;  %3596 = vmatpush1.bf16.msra.mxu0 %v3595_v23  ;;  %v2782_v48 = vld [vmem:[%s4661_s8 + $0x130] sm:$0xff]  ;;  %3603 = vmatpush1.bf16.msra.mxu1 %v3602_v61  ;;  %v3605_v4 = vpack.c.bf16 %v2939_v30, %v2938_v26  ;;  %vm2738_vm6 = vcmask 883712   ;;  %v2945_v23 = vld [vmem:[%s4662_s9 + $0x48] sm:$0xff] }
 0x59e   : > { %v2619_v12 = vpop.f32.mrb[36].mxu1  ;;  %v2662_v13 = vsel %vm1814_vm7, %v2661_v34, %v2660_v32  ;;  %v2717_v14 = vsel %vm1814_vm7, %v2716_v8, %v2715_v10  ;;  %v3599_v59 = vpack.c.bf16 %v2782_v48, %v2780_v25  ;;  %3598 = vmatprep.subr.bf16.mxu0 %v3597_v43  ;;  %3604 = vmatprep.subr.bf16.mxu1 %v3821_v60  ;;  %v2675_v34 = vpop.permute.xlu0 %2674  ;;  %v478_v8 = vld [vmem:[%s448_s12] sm:$0xff]  ;;  %vm2742_vm7 = vcmask 130048   ;;  %v2953_v25 = vld [vmem:[%s4662_s9 + $0x88] sm:$0xff] }
 0x59f   : > { %v3559_v17 = vpop.f32.mrb[37].mxu1  ;;  %v2669_v54 = vrot.slane %v2619_v12, 2  ;;  %v2724_v29 = vrot.slane %v2619_v12, 1  ;;  %v2729_v9 = vsel %vm533_vm2, %v478_v8, %v2675_v34  ;;  %v2952_v43 = vld [vmem:[%s4662_s9 + $0x80] sm:$0xff]  ;;  %vm3057_vm2 = vcmask 7168  }
 0x5a0   : > { %v2622_v16 = vpop.f32.mrb[38].mxu1  ;;  %v3626_v48 = vpack.c.bf16 %v2953_v25, %v2952_v43  ;;  %v3189_v26 = vld [vmem:[%s4663_s10 + $0x5] ss:$8 sm:$0x3] }
 0x5a1   : > { %v3560_v27 = vpop.f32.mrb[39].mxu1  ;;  %3600 = vmatpush1.bf16.msra.mxu0 %v3599_v59  ;;  %3606 = vmatpush1.bf16.msra.mxu1 %v3605_v4  ;;  %v2954_v59 = vld [vmem:[%s4662_s9 + $0x90] sm:$0xff]  ;;  %v2887_v61 = vrot.slane %v3189_v26, %v2793_v62 }
 0x5a2   : > { %v2490_v44 = vpop.f32.mrb[48].mxu0  ;;  %3302 = vmatprep.subr.msk.mxu0 %vm2801_vm15, %v2785_v49  ;;  %3607 = vmatprep.subr.bf16.mxu1 %v3821_v60 }
 0x5a3   : > { %v2663_v19 = vrot.slane %v2490_v44, 5  ;;  %v2718_v22 = vrot.slane %v2490_v44, 4  ;;  %v3541_v46 = vpop.f32.mrb[49].mxu0  ;;  %v2940_v44 = vld [vmem:[%s4662_s9 + $0x20] sm:$0xff] }
 0x5a4   : > { %v2493_v28 = vpop.f32.mrb[50].mxu0  ;;  %v3608_v39 = vpack.c.bf16 %v2941_v18, %v2940_v44  ;;  %v2944_v46 = vld [vmem:[%s4662_s9 + $0x40] sm:$0xff] }
 0x5a5   : > { %v2664_v31 = vsel %vm1816_vm8, %v2663_v19, %v2662_v13  ;;  %v2719_v40 = vsel %vm1816_vm8, %v2718_v22, %v2717_v14  ;;  %v3542_v45 = vpop.f32.mrb[51].mxu0  ;;  %3303 = vmatpush1.msk.msra.mxu0 %vm2801_vm15, %v2784_v51  ;;  %vm2797_vm8 = vcmask 277504   ;;  %v2943_v19 = vld [vmem:[%s4662_s9 + $0x38] sm:$0xff]  ;;  %v2956_v51 = vld [vmem:[%s4662_s9 + $0xa0] sm:$0xff] }
 0x5a6   : > { %v2666_v42 = vsel %vm1818_vm9, %v2665_v24, %v2664_v31  ;;  %v2721_v15 = vsel %vm1818_vm9, %v2720_v63, %v2719_v40  ;;  %vm2740_vm9 = vcmask 1031168   ;;  %3609 = vmatpush1.bf16.msra.mxu1 %v3608_v39  ;;  %v3611_v22 = vpack.c.bf16 %v2943_v19, %v2942_v20  ;;  %v2946_v63 = vld [vmem:[%s4662_s9 + $0x50] sm:$0xff]  ;;  %v2947_v28 = vld [vmem:[%s4662_s9 + $0x58] sm:$0xff]  ;;  %v2948_v40 = vld [vmem:[%s4662_s9 + $0x60] sm:$0xff] }
 0x5a7   : > { %3610 = vmatprep.subr.bf16.mxu1 %v3821_v60  ;;  %v3614_v24 = vpack.c.bf16 %v2945_v23, %v2944_v46  ;;  %v3617_v31 = vpack.c.bf16 %v2947_v28, %v2946_v63  ;;  %v2949_v45 = vld [vmem:[%s4662_s9 + $0x68] sm:$0xff]  ;;  %v512_v63 = vld [vmem:[%s4663_s10 + $0x12] ss:$0 sm:$0xff] }
 0x5a8   : > { %v3620_v1 = vpack.c.bf16 %v2949_v45, %v2948_v40 }
 0x5aa   : > { %v2576_v53 = vpop.f32.mrb[52].mxu0  ;;  %3612 = vmatpush1.bf16.msra.mxu1 %v3611_v22  ;;  %v510_v22 = vld [vmem:[%s4663_s10 + $0x10] ss:$0 sm:$0xff] }
 0x5ab   : > { %v2667_v52 = vrot.slane %v2576_v53, 3  ;;  %v2722_v36 = vrot.slane %v2576_v53, 2  ;;  %v3553_v58 = vpop.f32.mrb[53].mxu0  ;;  %3613 = vmatprep.subr.bf16.mxu1 %v3821_v60  ;;  %v2955_v53 = vld [vmem:[%s4662_s9 + $0x98] sm:$0xff] }
 0x5ac   : > { %v2579_v0 = vpop.f32.mrb[54].mxu0  ;;  %v3629_v49 = vpack.c.bf16 %v2955_v53, %v2954_v59  ;;  %v2959_v58 = vld [vmem:[%s4662_s9 + $0xb8] sm:$0xff] }
 0x5ad   : > { %v3554_v55 = vpop.f32.mrb[55].mxu0  ;;  %v2668_v35 = vsel %vm1820_vm10, %v2667_v52, %v2666_v42  ;;  %v2723_v56 = vsel %vm1820_vm10, %v2722_v36, %v2721_v15  ;;  %v2951_v42 = vld [vmem:[%s4662_s9 + $0x78] sm:$0xff]  ;;  %v2958_v36 = vld [vmem:[%s4662_s9 + $0xb0] sm:$0xff]  ;;  %v2960_v0 = vld [vmem:[%s4662_s9 + $0xc0] sm:$0xff]  ;;  %vm3059_vm10 = vcmask 15360  }
 0x5ae   : > { %v2670_v38 = vsel %vm1822_vm11, %v2669_v54, %v2668_v35  ;;  %v2725_v3 = vsel %vm1822_vm11, %v2724_v29, %v2723_v56  ;;  %3615 = vmatpush1.bf16.msra.mxu1 %v3614_v24  ;;  %v3623_v15 = vpack.c.bf16 %v2951_v42, %v2950_v41  ;;  %v2957_v54 = vld [vmem:[%s4662_s9 + $0xa8] sm:$0xff]  ;;  %v3635_v29 = vpack.c.bf16 %v2959_v58, %v2958_v36  ;;  %v513_v42 = vld [vmem:[%s4663_s10 + $0x13] ss:$0 sm:$0xff] }
 0x5af   : > { %2684 = vrot.lane.b32.xlu0 %v2670_v38, %s3822_s29  ;;  %v2672_v5 = vmul.f32 %v4343_v57, %v2670_v38  ;;  %v2731_v57 = vsel %vm2730_vm0, %v2729_v9, %v2679_v6  ;;  %3616 = vmatprep.subr.bf16.mxu1 %v3821_v60  ;;  %v3632_v52 = vpack.c.bf16 %v2957_v54, %v2956_v51  ;;  %s476_s29 = scalar_lea.vmem %s4664_s11, %s3928_s13 }
 0x5b0   : > { %v2790_v55 = vrot.slane %v3188_v50, %v3960_v21  ;;  %v2794_v35 = vrot.slane %v3188_v50, %v2793_v62  ;;  %v2883_v56 = vrot.slane %v3189_v26, %v3960_v21 }
 0x5b2   : > { %3618 = vmatpush1.bf16.msra.mxu1 %v3617_v31 }
 0x5b3   : > { %2692 = vrot.lane.b32.xlu0 %v2672_v5, %s3823_s30  ;;  %3619 = vmatprep.subr.bf16.mxu1 %v3821_v60 }
 0x5b6   : > { %3621 = vmatpush1.bf16.msra.mxu1 %v3620_v1 }
 0x5b7   : > { %2726 = vrot.lane.b32.xlu0 %v2725_v3, %s3824_s15  ;;  %3622 = vmatprep.subr.bf16.mxu1 %v3821_v60 }
 0x5ba   : > { %3624 = vmatpush1.bf16.msra.mxu1 %v3623_v15 }
 0x5bb   : > { %3625 = vmatprep.subr.bf16.mxu1 %v3821_v60 }
 0x5be   : > { %3627 = vmatpush1.bf16.msra.mxu1 %v3626_v48  ;;  %v514_v48 = vld [vmem:[%s4663_s10 + $0x14] ss:$0 sm:$0xff] }
 0x5bf   : > { %3628 = vmatprep.subr.bf16.mxu1 %v3821_v60 }
 0x5c2   : > { %3630 = vmatpush1.bf16.msra.mxu1 %v3629_v49 }
 0x5c3   : > { %3631 = vmatprep.subr.bf16.mxu1 %v3821_v60 }
 0x5c6   : > { %3633 = vmatpush1.bf16.msra.mxu1 %v3632_v52 }
 0x5c7   : > { %3634 = vmatprep.subr.bf16.mxu1 %v3821_v60 }
 0x5ca   : > { %3636 = vmatpush1.bf16.msra.mxu1 %v3635_v29 }
 0x5cb   : > { %3012 = vmatprep.subr.mxu1 %v3812_v2  ;;  %v3190_v2 = vld [vmem:[%s4663_s10 + $0x6] ss:$8 sm:$0x3] }
 0x5cc   : > { %v2896_v38 = vrot.slane %v3190_v2, %v3960_v21  ;;  %v2900_v4 = vrot.slane %v3190_v2, %v2793_v62 }
 0x5ce   : > { %3013 = vmatpush1.msra.mxu1 %v2960_v0 }
 0x601   : > { %v2682_v32 = vpop.permute.xlu1 %2681 }
 0x602   : > { %v2733_v11 = vsel %vm2732_vm1, %v2731_v57, %v2682_v32 }
 0x605   : > { %v2689_v37 = vpop.permute.xlu1 %2688 }
 0x609   : > { %v2710_v16 = vpop.permute.xlu1 %2709 }
 0x621   : > { %v2685_v10 = vpop.permute.xlu0 %2684 }
 0x622   : > { %v2735_v12 = vsel %vm2734_vm4, %v2733_v11, %v2685_v10 }
 0x623   : > { %v2737_v14 = vsel %vm2736_vm5, %v2735_v12, %v2689_v37  ;;  %v3191_v12 = vld [vmem:[%s4663_s10 + $0x7] ss:$8 sm:$0x3] }
 0x625   : > { %v2693_v13 = vpop.permute.xlu0 %2692 }
 0x626   : > { %v2739_v17 = vsel %vm2738_vm6, %v2737_v14, %v2693_v13  ;;  %v2923_v13 = vrot.slane %v3191_v12, %v3960_v21  ;;  %v511_v21 = vld [vmem:[%s4663_s10 + $0x11] ss:$0 sm:$0xff] }
 0x627   : > { %v2741_v47 = vsel %vm2740_vm9, %v2739_v17, %v2710_v16  ;;  %v2927_v17 = vrot.slane %v3191_v12, %v2793_v62 }
 0x629   : > { %v2727_v27 = vpop.permute.xlu0 %2726 }
 0x62a   : > { %v2743_v33 = vsel %vm2742_vm7, %v2710_v16, %v2727_v27 }
 0x62b   : > { %3304 = vmatprep.mubr.msk.f32.mxu0 %vm2797_vm8, %v2743_v33 }
 0x62c   : > { %2873 = vmatmul.mubr.f32.vlgmr.msra.gmra.mrb[56].mxu0 %v2741_v47 }
 0x6ff   : > { %v2874_v60 = vpop.f32.mrb[56].mxu0 }
 0x700   : > { %v2875_v30 = vadd.f32 %v2874_v60, %v2790_v55  ;;  %v2876_v3 = vpop.f32.mrb[57].mxu0 }
 0x701   : > { %v2877_v7 = vadd.f32 %v2876_v3, %v2794_v35 }
 0x702   : > { %v2890_v5 = vmul.f32 %v2883_v56, %v2875_v30 }
 0x703   : > { %v2891_v6 = vmul.f32 %v2887_v61, %v2877_v7 }
 0x704   : > { %v2903_v34 = vadd.f32 %v2896_v38, %v2890_v5 }
 0x705   : > { %v2904_v8 = vadd.f32 %v2900_v4, %v2891_v6 }
 0x706   : > { %v3305_v9 = vmul.f32 -1.442695, %v2903_v34 }
 0x707   : > { %v3306_v32 = vmul.f32 -1.442695, %v2904_v8 }
 0x708   : > { %3782 = vpow2.f32 %v3305_v9 }
 0x709   : > { %3784 = vpow2.f32 %v3306_v32 }
 0x712   : > { %v3783_v57 = vpop.eup %3782 }
 0x713   : > { %v3785_v10 = vpop.eup %3784  ;;  %v2911_v11 = vadd.f32 1.0, %v3783_v57 }
 0x714   : > { %v2912_v37 = vadd.f32 1.0, %v3785_v10 }
 0x715   : > { %3786 = vrcp.f32 %v2911_v11 }
 0x716   : > { %3788 = vrcp.f32 %v2912_v37 }
 0x71f   : > { %v3787_v14 = vpop.eup %3786 }
 0x720   : > { %v3789_v16 = vpop.eup %3788  ;;  %v2917_v27 = vsub.f32 1.0, %v3787_v14 }
 0x721   : > { %v2918_v33 = vsub.f32 1.0, %v3789_v16 }
 0x722   : > { %v2930_v47 = vmul.f32 %v2923_v13, %v2917_v27 }
 0x723   : > { %v2931_v44 = vmul.f32 %v2927_v17, %v2918_v33 }
 0x724   : > { %v2932_v18 = vadd.f32 %v3787_v14, %v2930_v47 }
 0x725   : > { %v2933_v39 = vadd.f32 %v3789_v16, %v2931_v44 }
 0x726   : > { %v2934_v19 = vmul.f32 %v2932_v18, %v2875_v30 }
 0x727   : > { %v2935_v20 = vmul.f32 %v2933_v39, %v2877_v7 }
 0x729   : > { %3307 = vmatprep.mubr.msk.f32.mxu1 %vm2734_vm4, %v2935_v20 }
 0x72a   : > { %3029 = vmatmul.mubr.f32.vlgmr.msra.gmra.mrb[40].mxu1 %v2934_v19 }
 0x7fd   : > { %v3030_v46 = vpop.f32.mrb[40].mxu1 }
 0x7fe   : > { %v3031_v23 = vadd.f32 %v3030_v46, %v510_v22  ;;  %v3032_v24 = vpop.f32.mrb[41].mxu1 }
 0x800   : > { %v3034_v28 = vmul.f32 %v3031_v23, %v511_v21 }
 0x802   : > { %v3035_v31 = vadd.f32 %v3034_v28, %v512_v63 }
 0x804   : > { %v3308_v40 = vmul.f32 -1.442695, %v3035_v31 }
 0x806   : > { %3790 = vpow2.f32 %v3308_v40 }
 0x810   : > { %v3791_v45 = vpop.eup %3790 }
 0x811   : > { %v3039_v1 = vadd.f32 1.0, %v3791_v45 }
 0x813   : > { %3792 = vrcp.f32 %v3039_v1 }
 0x81d   : > { %v3793_v41 = vpop.eup %3792 }
 0x81e   : > { %v3042_v15 = vsub.f32 1.0, %v3793_v41 }
 0x820   : > { %v3043_v43 = vmul.f32 %v3042_v15, %v513_v42 }
 0x822   : > { %v3044_v25 = vadd.f32 %v3793_v41, %v3043_v43 }
 0x824   : > { %v3045_v59 = vmul.f32 %v3044_v25, %v3031_v23 }
 0x826   : > { %v3046_v53 = vmul.f32 %v3045_v59, %v514_v48 }
 0x828   : > { %v3047_v49 = vsel %vm1576_vm3, %v3046_v53, 0.0 }
 0x829   : > { %3048 = vadd.xlane.f32.xlu1 %v3047_v49 }
 0x8b6   : > { %v3049_v51 = vpop.xlane.xlu1 %3048 }
 0x8b7   : > { %v3309_v54 = vmul.f32 -1.442695, %v3049_v51 }
 0x8b9   : > { %3794 = vpow2.f32 %v3309_v54 }
 0x8c3   : > { %v3795_v52 = vpop.eup %3794 }
 0x8c4   : > { %v3053_v36 = vadd.f32 1.0, %v3795_v52 }
 0x8c6   : > { %3796 = vrcp.f32 %v3053_v36 }
 0x8d0   : > { %v3797_v58 = vpop.eup %3796 }
 0x8d1   : > { %v3056_v29 = vsub.f32 1.0, %v3797_v58 }
 0x8d3   : > { %v3058_v0 = vsel %vm3057_vm2, %v3056_v29, %v3797_v58 }
 0x8d4   : > { %3060 = vst.msk [vmem:[%s476_s29] sm:$0xff] %vm3059_vm10, %v3058_v0 }
 0x8d5 PF: > { %s21_s17 = sadd.s32 1, %s3810_s17  }
 0x8d6   : > { %p18_p5 = scmp.ge.s32.totalorder %s21_s17, 4  }
 0x8d8   :  { %20 = sbr.rel (!%p18_p5) target bundleno = 1 (0x1), region = 118 }

</bundles_post_ra>
